<compile_context>
chip_gen: v7x
topology: tpu7x:2x2x1
jax: 0.10.0
libtpu: 0.0.40
codegen_flags: <defaults>
</compile_context>

<pallas_src>
import functools

import numpy as np
import jax
import jax.numpy as jnp
from jax.experimental import pallas as pl
from jax.experimental.pallas import tpu as pltpu


def _fused_kernel(x_ref, other_ref, w1_ref, b1_ref, w2_ref, b2_ref,
                  mask_ref, S_ref, Gsel_ref, o_ref, v1e_ref, *, G, Wp, C, MARG):
    # Per grid step (one batch element), channels on sublanes, flat spatial on lanes:
    #   x_ref     : (1, 32, H*W)      input pixels
    #   other_ref : (1, 8,  H1*W1)    residual add
    #   w1_ref    : (8, 32)           conv1 weight
    #   b1_ref    : (8, 1)            conv1 bias
    #   w2_ref    : (72, 8)           conv2 weight, row = (ky*3+kx)*8 + co, col = ci
    #   b2_ref    : (8, 1)            conv2 bias
    #   mask_ref  : (1, G)            1.0 on the v1 region of the conv2-padded grid
    #   S_ref     : (H*W, G)          0/1 scatter: input pixel -> padded-grid interior
    #   Gsel_ref  : (G, H1*W1)        0/1 gather: padded-grid -> output window
    #   o_ref     : (1, 8, H1*W1)
    #   v1e_ref   : VMEM (8, 2*MARG + G)  padded-v1 grid with MARG-lane margins

    # Zero only the narrow margins, every step (cheap: 2 vreg stores; robust when
    # the batch axis is split across TensorCores so step 0 may not run here).
    v1e_ref[:, 0:MARG] = jnp.zeros((C, MARG), jnp.float32)
    v1e_ref[:, MARG + G:MARG + G + MARG] = jnp.zeros((C, MARG), jnp.float32)

    # ---- conv1: 1x1 conv == (Cout x Cin) @ (Cin x H*W) matmul ----
    y = jnp.dot(w1_ref[...], x_ref[0], preferred_element_type=jnp.float32)   # (8, H*W)

    # ---- scatter interior + bias border onto the conv2-padded grid: ONE matmul,
    #      ONE 128-aligned wide store (replaces 16 unaligned masked stores) ----
    v1_pad = (jnp.dot(y, S_ref[...], preferred_element_type=jnp.float32)
              + b1_ref[...] * mask_ref[...])                                  # (8, G)
    v1e_ref[:, MARG:MARG + G] = v1_pad

    # ---- conv2 (3x3): 9 shifted taps, accumulated with tiny K=8 dots.
    #      The center tap (shift 0) is v1_pad itself and also supplies the +v1 term.
    acc = v1_pad                                                              # v1 contribution
    for t in range(9):
        ky, kx = t // 3, t % 3
        s = MARG + (ky - 1) * Wp + (kx - 1)
        tap = v1_pad if s == MARG else v1e_ref[:, s:s + G]                    # (8, G)
        acc = acc + jnp.dot(w2_ref[t * C:(t + 1) * C, :], tap,
                            preferred_element_type=jnp.float32)

    # ---- gather the valid H1*W1 window with ONE matmul, add b2 + other,
    #      single lane-dense output store (no read-modify-write of o_ref) ----
    o_ref[0] = (jnp.dot(acc, Gsel_ref[...], preferred_element_type=jnp.float32)
                + b2_ref[...] + other_ref[0])


def _build_constants(H, W):
    # Trace-time numpy constants (baked into the jitted program).
    H1, W1 = H + 2, W + 2
    Hp, Wp = H1 + 2, W1 + 2
    G = Hp * Wp
    # Scatter: input pixel (h, w) -> conv2-padded-grid position (h+2, w+2).
    S = np.zeros((H * W, G), np.float32)
    for h in range(H):
        for w in range(W):
            S[h * W + w, (h + 2) * Wp + (w + 2)] = 1.0
    # Gather: padded-grid position (i+1, j+1) -> output position (i, j).
    Gsel = np.zeros((G, H1 * W1), np.float32)
    for i in range(H1):
        for j in range(W1):
            Gsel[(i + 1) * Wp + (j + 1), i * W1 + j] = 1.0
    # Mask of the v1 region (rows/cols 1..H1 / 1..W1) inside the padded grid.
    mask = np.zeros((1, G), np.float32)
    for r in range(1, H1 + 1):
        mask[0, r * Wp + 1:r * Wp + 1 + W1] = 1.0
    return S, Gsel, mask


@jax.jit
def model_forward(x_nchw, params, other_nchw):
    w1, b1, w2, b2 = params          # w1 (8,32,1,1)  b1 (8,)  w2 (8,8,3,3)  b2 (8,)
    N, Cin, H, W = x_nchw.shape
    C = w1.shape[0]
    H1, W1 = H + 2, W + 2
    Hp, Wp = H1 + 2, W1 + 2
    G = Hp * Wp
    MARG = 128                       # margin >= Wp+1 and vreg-aligned store offset
    ext = G + 2 * MARG

    S_np, Gsel_np, mask_np = _build_constants(H, W)

    # Layout-preserving reshapes: channel-major, spatial flattened on lanes.
    x2 = x_nchw.reshape(N, Cin, H * W)
    other2 = other_nchw.reshape(N, C, H1 * W1)
    w1m = w1.reshape(C, Cin)
    b1c = b1.reshape(C, 1)
    w2s = jnp.transpose(w2, (2, 3, 0, 1)).reshape(9 * C, C)   # row = (ky*3+kx)*C + co
    b2c = b2.reshape(C, 1)

    kernel = functools.partial(_fused_kernel, G=G, Wp=Wp, C=C, MARG=MARG)

    out2 = pl.pallas_call(
        kernel,
        out_shape=jax.ShapeDtypeStruct((N, C, H1 * W1), jnp.float32),
        grid=(N,),
        in_specs=[
            pl.BlockSpec((1, Cin, H * W), lambda n: (n, 0, 0)),
            pl.BlockSpec((1, C, H1 * W1), lambda n: (n, 0, 0)),
            pl.BlockSpec((C, Cin), lambda n: (0, 0)),
            pl.BlockSpec((C, 1), lambda n: (0, 0)),
            pl.BlockSpec((9 * C, C), lambda n: (0, 0)),
            pl.BlockSpec((C, 1), lambda n: (0, 0)),
            pl.BlockSpec((1, G), lambda n: (0, 0)),
            pl.BlockSpec((H * W, G), lambda n: (0, 0)),
            pl.BlockSpec((G, H1 * W1), lambda n: (0, 0)),
        ],
        out_specs=pl.BlockSpec((1, C, H1 * W1), lambda n: (n, 0, 0)),
        scratch_shapes=[
            pltpu.VMEM((C, ext), jnp.float32),   # padded-v1 grid with margins
        ],
        compiler_params=pltpu.CompilerParams(
            dimension_semantics=("parallel",)),  # v7x: batch over 2 TensorCores
    )(x2, other2, w1m, b1c, w2s, b2c,
      jnp.asarray(mask_np), jnp.asarray(S_np), jnp.asarray(Gsel_np))

    return out2.reshape(N, C, H1, W1)            # already NCHW; reshape is free


def reference_forward(x_nchw, params, other_nchw):
    # Pure-JAX reference (lax conv) for correctness checking.
    w1, b1, w2, b2 = params
    dn = ('NCHW', 'OIHW', 'NCHW')
    v1 = jax.lax.conv_general_dilated(x_nchw, w1, (1, 1), ((1, 1), (1, 1)),
                                      dimension_numbers=dn) + b1[None, :, None, None]
    v2 = jax.lax.conv_general_dilated(v1, w2, (1, 1), ((1, 1), (1, 1)),
                                      dimension_numbers=dn) + b2[None, :, None, None]
    return v1 + v2 + other_nchw


if __name__ == "__main__":
    key = jax.random.PRNGKey(0)
    k1, k2, k3, k4, k5, k6 = jax.random.split(key, 6)

    # Shapes consistent with the module: N=2, Cin=32, 16x16 spatial.
    x = jax.random.normal(k1, (2, 32, 16, 16), jnp.float32)
    w1 = jax.random.normal(k2, (8, 32, 1, 1), jnp.float32) * 0.1
    b1 = jax.random.normal(k3, (8,), jnp.float32) * 0.1
    w2 = jax.random.normal(k4, (8, 8, 3, 3), jnp.float32) * 0.1
    b2 = jax.random.normal(k5, (8,), jnp.float32) * 0.1
    # conv1 padding=1 grows spatial dims, so v3/other have shape (2, 8, 18, 18).
    other = jax.random.normal(k6, (2, 8, 18, 18), jnp.float32)

    params = (w1, b1, w2, b2)
    out = jax.block_until_ready(model_forward(x, params, other))
    ref = jax.block_until_ready(reference_forward(x, params, other))

    assert out.shape == (2, 8, 18, 18), out.shape
    err = float(jnp.max(jnp.abs(out - ref)))
    assert jnp.allclose(out, ref, atol=1e-4, rtol=1e-4), err

    print("KERNEL_OK")
</pallas_src>

<mosaic_0001>
module attributes {stable_mosaic.version = 11 : i64} {
  func.func @_fused_kernel(%arg0: i32, %arg1: memref<1x32x256xf32, #tpu.memory_space<vmem>>, %arg2: memref<1x8x324xf32, #tpu.memory_space<vmem>>, %arg3: memref<8x32xf32, #tpu.memory_space<vmem>>, %arg4: memref<8x1xf32, #tpu.memory_space<vmem>>, %arg5: memref<72x8xf32, #tpu.memory_space<vmem>>, %arg6: memref<8x1xf32, #tpu.memory_space<vmem>>, %arg7: memref<1x400xf32, #tpu.memory_space<vmem>>, %arg8: memref<256x400xf32, #tpu.memory_space<vmem>>, %arg9: memref<400x324xf32, #tpu.memory_space<vmem>>, %arg10: memref<1x8x324xf32, #tpu.memory_space<vmem>>, %arg11: memref<8x656xf32, #tpu.memory_space<vmem>>) attributes {dimension_semantics = [#tpu.dimension_semantics<parallel>], iteration_bounds = array<i64: 2>, scalar_prefetch = 0 : i64, scratch_operands = 1 : i64, tpu.core_type = #tpu.core_type<tc>, window_params = [{transform_indices = @transform_0, window_bounds = array<i64: 1, 32, 256>}, {transform_indices = @transform_1, window_bounds = array<i64: 1, 8, 324>}, {pipeline_mode = #tpu.pipeline_mode<synchronous>, transform_indices = @transform_2, window_bounds = array<i64: 8, 32>}, {pipeline_mode = #tpu.pipeline_mode<synchronous>, transform_indices = @transform_3, window_bounds = array<i64: 8, 1>}, {pipeline_mode = #tpu.pipeline_mode<synchronous>, transform_indices = @transform_4, window_bounds = array<i64: 72, 8>}, {pipeline_mode = #tpu.pipeline_mode<synchronous>, transform_indices = @transform_5, window_bounds = array<i64: 8, 1>}, {pipeline_mode = #tpu.pipeline_mode<synchronous>, transform_indices = @transform_6, window_bounds = array<i64: 1, 400>}, {pipeline_mode = #tpu.pipeline_mode<synchronous>, transform_indices = @transform_7, window_bounds = array<i64: 256, 400>}, {pipeline_mode = #tpu.pipeline_mode<synchronous>, transform_indices = @transform_8, window_bounds = array<i64: 400, 324>}, {transform_indices = @transform_9, window_bounds = array<i64: 1, 8, 324>}]} {
    %cst = arith.constant 0.000000e+00 : f32
    %0 = vector.broadcast %cst : f32 to vector<8x128xf32>
    %c0 = arith.constant 0 : index
    %c0_0 = arith.constant 0 : index
    %1 = vector.load %arg11[%c0, %c0_0] : memref<8x656xf32, #tpu.memory_space<vmem>>, vector<8x128xf32>
    tpu.vector_store %arg11[%c0, %c0_0], %0 {strides = array<i32>} : memref<8x656xf32, #tpu.memory_space<vmem>>, vector<8x128xf32>,
    %cst_1 = arith.constant 0.000000e+00 : f32
    %2 = vector.broadcast %cst_1 : f32 to vector<8x128xf32>
    %c0_2 = arith.constant 0 : index
    %c528 = arith.constant 528 : index
    %3 = vector.load %arg11[%c0_2, %c528] : memref<8x656xf32, #tpu.memory_space<vmem>>, vector<8x128xf32>
    tpu.vector_store %arg11[%c0_2, %c528], %2 {strides = array<i32>} : memref<8x656xf32, #tpu.memory_space<vmem>>, vector<8x128xf32>,
    %c0_3 = arith.constant 0 : index
    %c0_4 = arith.constant 0 : index
    %4 = vector.load %arg3[%c0_3, %c0_4] : memref<8x32xf32, #tpu.memory_space<vmem>>, vector<8x32xf32>
    %c0_5 = arith.constant 0 : index
    %c0_6 = arith.constant 0 : index
    %c0_7 = arith.constant 0 : index
    %5 = vector.load %arg1[%c0_5, %c0_6, %c0_7] : memref<1x32x256xf32, #tpu.memory_space<vmem>>, vector<1x32x256xf32>
    %6 = vector.shape_cast %5 : vector<1x32x256xf32> to vector<32x256xf32>
    %cst_8 = arith.constant dense<0.000000e+00> : vector<8x256xf32>
    %7 = tpu.matmul %4, %6, %cst_8 {dimension_numbers = #tpu.dot_dimension_numbers<[1], [0], [0], [1], [0, 0, 1, 1], [], []>} : vector<8x32xf32>, vector<32x256xf32>, vector<8x256xf32> -> vector<8x256xf32>
    %c0_9 = arith.constant 0 : index
    %c0_10 = arith.constant 0 : index
    %8 = vector.load %arg8[%c0_9, %c0_10] : memref<256x400xf32, #tpu.memory_space<vmem>>, vector<256x400xf32>
    %cst_11 = arith.constant dense<0.000000e+00> : vector<8x400xf32>
    %9 = tpu.matmul %7, %8, %cst_11 {dimension_numbers = #tpu.dot_dimension_numbers<[1], [0], [0], [1], [0, 0, 1, 1], [], []>} : vector<8x256xf32>, vector<256x400xf32>, vector<8x400xf32> -> vector<8x400xf32>
    %c0_12 = arith.constant 0 : index
    %c0_13 = arith.constant 0 : index
    %10 = vector.load %arg4[%c0_12, %c0_13] : memref<8x1xf32, #tpu.memory_space<vmem>>, vector<8x1xf32>
    %c0_14 = arith.constant 0 : index
    %c0_15 = arith.constant 0 : index
    %11 = vector.load %arg7[%c0_14, %c0_15] : memref<1x400xf32, #tpu.memory_space<vmem>>, vector<1x400xf32>
    %12 = vector.broadcast %10 : vector<8x1xf32> to vector<8x400xf32>
    %13 = vector.broadcast %11 : vector<1x400xf32> to vector<8x400xf32>
    %14 = arith.mulf %12, %13 : vector<8x400xf32>
    %15 = arith.addf %9, %14 : vector<8x400xf32>
    %c0_16 = arith.constant 0 : index
    %c128 = arith.constant 128 : index
    %16 = vector.load %arg11[%c0_16, %c128] : memref<8x656xf32, #tpu.memory_space<vmem>>, vector<8x400xf32>
    tpu.vector_store %arg11[%c0_16, %c128], %15 {strides = array<i32>} : memref<8x656xf32, #tpu.memory_space<vmem>>, vector<8x400xf32>,
    %c0_17 = arith.constant 0 : index
    %c107 = arith.constant 107 : index
    %17 = vector.load %arg11[%c0_17, %c107] : memref<8x656xf32, #tpu.memory_space<vmem>>, vector<8x400xf32>
    %c0_18 = arith.constant 0 : index
    %c0_19 = arith.constant 0 : index
    %18 = vector.load %arg5[%c0_18, %c0_19] : memref<72x8xf32, #tpu.memory_space<vmem>>, vector<8x8xf32>
    %cst_20 = arith.constant dense<0.000000e+00> : vector<8x400xf32>
    %19 = tpu.matmul %18, %17, %cst_20 {dimension_numbers = #tpu.dot_dimension_numbers<[1], [0], [0], [1], [0, 0, 1, 1], [], []>} : vector<8x8xf32>, vector<8x400xf32>, vector<8x400xf32> -> vector<8x400xf32>
    %20 = arith.addf %15, %19 : vector<8x400xf32>
    %c0_21 = arith.constant 0 : index
    %c108 = arith.constant 108 : index
    %21 = vector.load %arg11[%c0_21, %c108] : memref<8x656xf32, #tpu.memory_space<vmem>>, vector<8x400xf32>
    %c8 = arith.constant 8 : index
    %c0_22 = arith.constant 0 : index
    %22 = vector.load %arg5[%c8, %c0_22] : memref<72x8xf32, #tpu.memory_space<vmem>>, vector<8x8xf32>
    %cst_23 = arith.constant dense<0.000000e+00> : vector<8x400xf32>
    %23 = tpu.matmul %22, %21, %cst_23 {dimension_numbers = #tpu.dot_dimension_numbers<[1], [0], [0], [1], [0, 0, 1, 1], [], []>} : vector<8x8xf32>, vector<8x400xf32>, vector<8x400xf32> -> vector<8x400xf32>
    %24 = arith.addf %20, %23 : vector<8x400xf32>
    %c0_24 = arith.constant 0 : index
    %c109 = arith.constant 109 : index
    %25 = vector.load %arg11[%c0_24, %c109] : memref<8x656xf32, #tpu.memory_space<vmem>>, vector<8x400xf32>
    %c16 = arith.constant 16 : index
    %c0_25 = arith.constant 0 : index
    %26 = vector.load %arg5[%c16, %c0_25] : memref<72x8xf32, #tpu.memory_space<vmem>>, vector<8x8xf32>
    %cst_26 = arith.constant dense<0.000000e+00> : vector<8x400xf32>
    %27 = tpu.matmul %26, %25, %cst_26 {dimension_numbers = #tpu.dot_dimension_numbers<[1], [0], [0], [1], [0, 0, 1, 1], [], []>} : vector<8x8xf32>, vector<8x400xf32>, vector<8x400xf32> -> vector<8x400xf32>
    %28 = arith.addf %24, %27 : vector<8x400xf32>
    %c0_27 = arith.constant 0 : index
    %c127 = arith.constant 127 : index
    %29 = vector.load %arg11[%c0_27, %c127] : memref<8x656xf32, #tpu.memory_space<vmem>>, vector<8x400xf32>
    %c24 = arith.constant 24 : index
    %c0_28 = arith.constant 0 : index
    %30 = vector.load %arg5[%c24, %c0_28] : memref<72x8xf32, #tpu.memory_space<vmem>>, vector<8x8xf32>
    %cst_29 = arith.constant dense<0.000000e+00> : vector<8x400xf32>
    %31 = tpu.matmul %30, %29, %cst_29 {dimension_numbers = #tpu.dot_dimension_numbers<[1], [0], [0], [1], [0, 0, 1, 1], [], []>} : vector<8x8xf32>, vector<8x400xf32>, vector<8x400xf32> -> vector<8x400xf32>
    %32 = arith.addf %28, %31 : vector<8x400xf32>
    %c32 = arith.constant 32 : index
    %c0_30 = arith.constant 0 : index
    %33 = vector.load %arg5[%c32, %c0_30] : memref<72x8xf32, #tpu.memory_space<vmem>>, vector<8x8xf32>
    %cst_31 = arith.constant dense<0.000000e+00> : vector<8x400xf32>
    %34 = tpu.matmul %33, %15, %cst_31 {dimension_numbers = #tpu.dot_dimension_numbers<[1], [0], [0], [1], [0, 0, 1, 1], [], []>} : vector<8x8xf32>, vector<8x400xf32>, vector<8x400xf32> -> vector<8x400xf32>
    %35 = arith.addf %32, %34 : vector<8x400xf32>
    %c0_32 = arith.constant 0 : index
    %c129 = arith.constant 129 : index
    %36 = vector.load %arg11[%c0_32, %c129] : memref<8x656xf32, #tpu.memory_space<vmem>>, vector<8x400xf32>
    %c40 = arith.constant 40 : index
    %c0_33 = arith.constant 0 : index
    %37 = vector.load %arg5[%c40, %c0_33] : memref<72x8xf32, #tpu.memory_space<vmem>>, vector<8x8xf32>
    %cst_34 = arith.constant dense<0.000000e+00> : vector<8x400xf32>
    %38 = tpu.matmul %37, %36, %cst_34 {dimension_numbers = #tpu.dot_dimension_numbers<[1], [0], [0], [1], [0, 0, 1, 1], [], []>} : vector<8x8xf32>, vector<8x400xf32>, vector<8x400xf32> -> vector<8x400xf32>
    %39 = arith.addf %35, %38 : vector<8x400xf32>
    %c0_35 = arith.constant 0 : index
    %c147 = arith.constant 147 : index
    %40 = vector.load %arg11[%c0_35, %c147] : memref<8x656xf32, #tpu.memory_space<vmem>>, vector<8x400xf32>
    %c48 = arith.constant 48 : index
    %c0_36 = arith.constant 0 : index
    %41 = vector.load %arg5[%c48, %c0_36] : memref<72x8xf32, #tpu.memory_space<vmem>>, vector<8x8xf32>
    %cst_37 = arith.constant dense<0.000000e+00> : vector<8x400xf32>
    %42 = tpu.matmul %41, %40, %cst_37 {dimension_numbers = #tpu.dot_dimension_numbers<[1], [0], [0], [1], [0, 0, 1, 1], [], []>} : vector<8x8xf32>, vector<8x400xf32>, vector<8x400xf32> -> vector<8x400xf32>
    %43 = arith.addf %39, %42 : vector<8x400xf32>
    %c0_38 = arith.constant 0 : index
    %c148 = arith.constant 148 : index
    %44 = vector.load %arg11[%c0_38, %c148] : memref<8x656xf32, #tpu.memory_space<vmem>>, vector<8x400xf32>
    %c56 = arith.constant 56 : index
    %c0_39 = arith.constant 0 : index
    %45 = vector.load %arg5[%c56, %c0_39] : memref<72x8xf32, #tpu.memory_space<vmem>>, vector<8x8xf32>
    %cst_40 = arith.constant dense<0.000000e+00> : vector<8x400xf32>
    %46 = tpu.matmul %45, %44, %cst_40 {dimension_numbers = #tpu.dot_dimension_numbers<[1], [0], [0], [1], [0, 0, 1, 1], [], []>} : vector<8x8xf32>, vector<8x400xf32>, vector<8x400xf32> -> vector<8x400xf32>
    %47 = arith.addf %43, %46 : vector<8x400xf32>
    %c0_41 = arith.constant 0 : index
    %c149 = arith.constant 149 : index
    %48 = vector.load %arg11[%c0_41, %c149] : memref<8x656xf32, #tpu.memory_space<vmem>>, vector<8x400xf32>
    %c64 = arith.constant 64 : index
    %c0_42 = arith.constant 0 : index
    %49 = vector.load %arg5[%c64, %c0_42] : memref<72x8xf32, #tpu.memory_space<vmem>>, vector<8x8xf32>
    %cst_43 = arith.constant dense<0.000000e+00> : vector<8x400xf32>
    %50 = tpu.matmul %49, %48, %cst_43 {dimension_numbers = #tpu.dot_dimension_numbers<[1], [0], [0], [1], [0, 0, 1, 1], [], []>} : vector<8x8xf32>, vector<8x400xf32>, vector<8x400xf32> -> vector<8x400xf32>
    %51 = arith.addf %47, %50 : vector<8x400xf32>
    %c0_44 = arith.constant 0 : index
    %c0_45 = arith.constant 0 : index
    %52 = vector.load %arg9[%c0_44, %c0_45] : memref<400x324xf32, #tpu.memory_space<vmem>>, vector<400x324xf32>
    %cst_46 = arith.constant dense<0.000000e+00> : vector<8x324xf32>
    %53 = tpu.matmul %51, %52, %cst_46 {dimension_numbers = #tpu.dot_dimension_numbers<[1], [0], [0], [1], [0, 0, 1, 1], [], []>} : vector<8x400xf32>, vector<400x324xf32>, vector<8x324xf32> -> vector<8x324xf32>
    %c0_47 = arith.constant 0 : index
    %c0_48 = arith.constant 0 : index
    %54 = vector.load %arg6[%c0_47, %c0_48] : memref<8x1xf32, #tpu.memory_space<vmem>>, vector<8x1xf32>
    %55 = vector.broadcast %54 : vector<8x1xf32> to vector<8x324xf32>
    %56 = arith.addf %53, %55 : vector<8x324xf32>
    %c0_49 = arith.constant 0 : index
    %c0_50 = arith.constant 0 : index
    %c0_51 = arith.constant 0 : index
    %57 = vector.load %arg2[%c0_49, %c0_50, %c0_51] : memref<1x8x324xf32, #tpu.memory_space<vmem>>, vector<1x8x324xf32>
    %58 = vector.shape_cast %57 : vector<1x8x324xf32> to vector<8x324xf32>
    %59 = arith.addf %56, %58 : vector<8x324xf32>
    %c0_52 = arith.constant 0 : index
    %c0_53 = arith.constant 0 : index
    %c0_54 = arith.constant 0 : index
    %60 = vector.load %arg10[%c0_52, %c0_53, %c0_54] : memref<1x8x324xf32, #tpu.memory_space<vmem>>, vector<1x8x324xf32>
    %61 = vector.shape_cast %60 : vector<1x8x324xf32> to vector<8x324xf32>
    %62 = vector.shape_cast %59 : vector<8x324xf32> to vector<1x8x324xf32>
    tpu.vector_store %arg10[%c0_52, %c0_53, %c0_54], %62 {strides = array<i32>} : memref<1x8x324xf32, #tpu.memory_space<vmem>>, vector<1x8x324xf32>,
    return
  }
  func.func @transform_0(%arg0: i32) -> (i32, i32, i32) {
    %c0_i32 = arith.constant 0 : i32
    %c0_i32_0 = arith.constant 0 : i32
    %c0_i32_1 = arith.constant 0 : i32
    return %arg0, %c0_i32, %c0_i32_0 : i32, i32, i32
  }
  func.func @transform_1(%arg0: i32) -> (i32, i32, i32) {
    %c0_i32 = arith.constant 0 : i32
    %c0_i32_0 = arith.constant 0 : i32
    %c0_i32_1 = arith.constant 0 : i32
    return %arg0, %c0_i32, %c0_i32_0 : i32, i32, i32
  }
  func.func @transform_2(%arg0: i32) -> (i32, i32) {
    %c0_i32 = arith.constant 0 : i32
    %c0_i32_0 = arith.constant 0 : i32
    %c0_i32_1 = arith.constant 0 : i32
    return %c0_i32, %c0_i32_0 : i32, i32
  }
  func.func @transform_3(%arg0: i32) -> (i32, i32) {
    %c0_i32 = arith.constant 0 : i32
    %c0_i32_0 = arith.constant 0 : i32
    %c0_i32_1 = arith.constant 0 : i32
    return %c0_i32, %c0_i32_0 : i32, i32
  }
  func.func @transform_4(%arg0: i32) -> (i32, i32) {
    %c0_i32 = arith.constant 0 : i32
    %c0_i32_0 = arith.constant 0 : i32
    %c0_i32_1 = arith.constant 0 : i32
    return %c0_i32, %c0_i32_0 : i32, i32
  }
  func.func @transform_5(%arg0: i32) -> (i32, i32) {
    %c0_i32 = arith.constant 0 : i32
    %c0_i32_0 = arith.constant 0 : i32
    %c0_i32_1 = arith.constant 0 : i32
    return %c0_i32, %c0_i32_0 : i32, i32
  }
  func.func @transform_6(%arg0: i32) -> (i32, i32) {
    %c0_i32 = arith.constant 0 : i32
    %c0_i32_0 = arith.constant 0 : i32
    %c0_i32_1 = arith.constant 0 : i32
    return %c0_i32, %c0_i32_0 : i32, i32
  }
  func.func @transform_7(%arg0: i32) -> (i32, i32) {
    %c0_i32 = arith.constant 0 : i32
    %c0_i32_0 = arith.constant 0 : i32
    %c0_i32_1 = arith.constant 0 : i32
    return %c0_i32, %c0_i32_0 : i32, i32
  }
  func.func @transform_8(%arg0: i32) -> (i32, i32) {
    %c0_i32 = arith.constant 0 : i32
    %c0_i32_0 = arith.constant 0 : i32
    %c0_i32_1 = arith.constant 0 : i32
    return %c0_i32, %c0_i32_0 : i32, i32
  }
  func.func @transform_9(%arg0: i32) -> (i32, i32, i32) {
    %c0_i32 = arith.constant 0 : i32
    %c0_i32_0 = arith.constant 0 : i32
    %c0_i32_1 = arith.constant 0 : i32
    return %arg0, %c0_i32, %c0_i32_0 : i32, i32, i32
  }
}

</mosaic_0001>

<bundles_post_ra>
// kernel: model_forward.1
= control target key start
LH: loop header
LB: loop body
LE: loop exit
PB: predicated region body
PF: predicated region fallthrough
CT: control target
= control target key end

     0   :  { %14 = vsyncpa [#allocation4], 0  ;;  %s3337_s30 = smov 0   ;;  %s4004_s0 = inlined_call_operand.vmem [shape: f32[2,32,256], index: 0, kind: input, shape index: {}]   ;;  %s4005_s1 = inlined_call_operand.vmem [shape: f32[2,8,324], index: 1, kind: input, shape index: {}]   ;;  %s4006_s2 = inlined_call_operand.vmem [shape: f32[8,32], index: 2, kind: input, shape index: {}]   ;;  %s4007_s3 = inlined_call_operand.vmem [shape: f32[8,1], index: 3, kind: input, shape index: {}]   ;;  %s4008_s4 = inlined_call_operand.vmem [shape: f32[72,8], index: 4, kind: input, shape index: {}]   ;;  %s4009_s5 = inlined_call_operand.vmem [shape: f32[8,1], index: 5, kind: input, shape index: {}]   ;;  %s4010_s6 = inlined_call_operand.vmem [shape: f32[1,400], index: 6, kind: input, shape index: {}]   ;;  %s4011_s7 = inlined_call_operand.hbm [shape: f32[256,400], index: 7, kind: input, shape index: {}]   ;;  %s4012_s8 = inlined_call_operand.vmem [shape: f32[400,324], index: 8, kind: input, shape index: {}]   ;;  %s4013_s9 = inlined_call_operand.vmem [shape: f32[2,8,324], index: 9, kind: output, shape index: {}]  }
   0x1 LB: > { %s3343_s10 = sadd.s32 4294967295, %s3271_s30   ;;  %p2795_p0 = scmp.ge.s32.totalorder %s3271_s30, 1  ;;  %s3271_s30 = sphi %s3337_s30, %s20_s30  }
   0x2   : > { %p250_p1 = scmp.lt.s32.totalorder %s3271_s30, 3  ;;  %s3273_s11 = smov [#allocation3]  }
   0x3   : > { %s277_s12 = sshll.u32 %s3273_s11, 4  ;;  %p4014_p3 = scmp.eq.s32.totalorder %s3343_s10, 0  ;;  %s278_s12 = int_to_ptr.vmem [resolvable:$true] %s277_s12 }
   0x4   : > { %p3347_p2 = pnand %p2795_p0, %p250_p1  ;;  %s3233_s17 = scalar_lea.hbm %s4011_s7, 16384 }
   0x5   : > { %p3234_p6 = scmp.ne.s32.totalorder %s4011_s7, %s3233_s17  ;;  %p3240_p10 = scmp.lt.u32.totalorder %s3233_s17, %s4011_s7 }
   0x6   : > { %s4016_s13 = scalar_select %p3347_p2, 1, 0 }
   0x7   : > { %p3203_p4 = pneg %p3347_p2 }
   0x9   : > { %p3356_p5 = pnand %p4014_p3, %p3203_p4 }
   0xb   : > { %p3235_p7 = pneg %p3356_p5 }
   0xd   : > { %p3236_p8 = pnand %p3235_p7, %p3234_p6 }
   0xf   : > { %p3237_p9 = pneg %p3236_p8 }
  0x11   : > { %p3242_p11 = pnand %p3240_p10, %p3237_p9 }
  0x13   : > { %3245 = shalt.err (!%p3242_p11)
}
  0x14   : > { %s3246_s22 = scalar_lea.vmem %s278_s12, 16384  ;;  %p3254_p1 = scmp.lt.s32.totalorder %s278_s12, %s278_s12 }
  0x15   : > { %p3247_p12 = scmp.ne.s32.totalorder %s278_s12, %s3246_s22  ;;  %p3255_p4 = scmp.lt.s32.totalorder %s3246_s22, %s3246_s22 }
  0x17   : > { %p3249_p13 = pnand %p3247_p12, %p3235_p7  ;;  %p3256_p3 = por %p3255_p4, %p3254_p1 }
  0x19   : > { %p3250_p0 = pneg %p3249_p13 }
  0x1b   : > { %p3257_p2 = pnand %p3256_p3, %p3250_p0 }
  0x1d   : > { %3260 = shalt.err (!%p3257_p2)
}
  0x1e   : > { %s3274_s23 = smov 512   ;;  %s3275_s24 = smov 32  }
  0x1f   : > { %3206 = dma.hbm_to_vmem [thread:$0]  (!%p3356_p5), %s4011_s7, 16384, %s278_s12, [#allocation4], %s3274_s23, %s3274_s23, %s3275_s24  }
  0x20   : > { %p4018_p6 = scmp.ne.s32.totalorder %s4016_s13, 0 }
  0x21   : > { %p4019_p8 = scmp.eq.s32.totalorder (!%p4018_p6), %s3343_s10, 0 }
  0x22   : > { %312 = sbr.rel (%p4018_p6) target bundleno = 1130 (0x46a), region = 56 }
  0x29   : > { %3266 = dma.done.wait (%p4019_p8), [#allocation4], 16384   ;;  %p4020_p7 = pmov %p4019_p8 }
  0x2a   : > { %p353_p2 = scmp.lt.s32.totalorder %s3343_s10, 1  ;;  %v3276_v0 = vmov 0.0   ;;  %v458_v12 = vld [vmem:[#allocation3 + $0x8] sm:$0xff]  ;;  %v460_v14 = vld [vmem:[#allocation3 + $0x18] sm:$0xff]  ;;  %v457_v18 = vld [vmem:[#allocation3] sm:$0xff]  ;;  %vm382_vm0 = vcmask 261120  }
  0x2b   : > { %3268 = vsyncadd (%p4020_p7), [#allocation4], 4294950912  ;;  %450 = vmatprep.mubr.f32.mxu0 %v3276_v0  ;;  %368 = vst [vmem:[#allocation2] sm:$0xff] %v3276_v0  ;;  %v462_v13 = vld [vmem:[#allocation3 + $0x28] sm:$0xff]  ;;  %v464_v17 = vld [vmem:[#allocation3 + $0x38] sm:$0xff]  ;;  %s3278_s16 = smov 19  }
  0x2c   : > { %s4022_s10 = smov (!%p353_p2, %s3343_s10), 1  ;;  %v2871_v16 = vpack.c.bf16 %v462_v13, %v458_v12  ;;  %v461_v19 = vld [vmem:[#allocation3 + $0x20] sm:$0xff]  ;;  %v2935_v20 = vpack.c.bf16 %v464_v17, %v460_v14  ;;  %v459_v22 = vld [vmem:[#allocation3 + $0x10] sm:$0xff]  ;;  %v466_v24 = vld [vmem:[#allocation3 + $0x48] sm:$0xff]  ;;  %1105 = vrot.lane.b32.xlu1 %v3276_v0, %s3278_s16  ;;  %vm369_vm1 = vcmask 1047680   ;;  %vm371_vm2 = vcmask 130048  }
  0x2d   : > { %s2827_s27 = sshll.u32 %s4022_s10, 6  ;;  %v2873_v21 = vpack.c.bf16 %v461_v19, %v457_v18  ;;  %v463_v23 = vld [vmem:[#allocation3 + $0x30] sm:$0xff]  ;;  %v470_v25 = vld [vmem:[#allocation3 + $0x68] sm:$0xff]  ;;  %v468_v26 = vld [vmem:[#allocation3 + $0x58] sm:$0xff]  ;;  %370 = vst.msk [vmem:[#allocation2 + $0x20] sm:$0xff] %vm369_vm1, %v3276_v0  ;;  %s3279_s19 = smov 1  }
  0x2e   : > { %s357_s11 = scalar_lea.vmem %s4004_s0, %s2827_s27  ;;  %2872 = vmatprep.subr.bf16.mxu1 %v2871_v16  ;;  %v472_v27 = vld [vmem:[#allocation3 + $0x78] sm:$0xff]  ;;  %v2875_v28 = vpack.c.bf16 %v470_v25, %v466_v24  ;;  %v465_v29 = vld [vmem:[#allocation3 + $0x40] sm:$0xff]  ;;  %v373_v31 = vld [vmem:[%s4006_s2] sm:$0xff]  ;;  %v2937_v32 = vpack.c.bf16 %v463_v23, %v459_v22  ;;  %s3280_s20 = smov 127   ;;  %vm1113_vm3 = vcmask 154624   ;;  %vm788_vm4 = vcmask 64512  }
  0x2f   : > { %v375_v1 = vld [vmem:[%s357_s11 + $0x8] sm:$0xff]  ;;  %v377_v2 = vld [vmem:[%s357_s11 + $0x18] sm:$0xff]  ;;  %v374_v3 = vld [vmem:[%s357_s11] sm:$0xff]  ;;  %2874 = vmatpush1.bf16.msra.mxu1 %v2873_v21  ;;  %v2939_v36 = vpack.c.bf16 %v472_v27, %v468_v26  ;;  %s3281_s21 = smov 109   ;;  %s3282_s22 = smov 21   ;;  %vm1291_vm5 = vcmask 7168  }
  0x30   : > { %v2863_v4 = vpack.c.bf16 %v377_v2, %v375_v1  ;;  %v376_v5 = vld [vmem:[%s357_s11 + $0x10] sm:$0xff]  ;;  %v379_v6 = vld [vmem:[%s357_s11 + $0x28] sm:$0xff]  ;;  %v381_v7 = vld [vmem:[%s357_s11 + $0x38] sm:$0xff]  ;;  %2876 = vmatprep.subr.bf16.mxu1 %v2875_v28  ;;  %s3283_s23 = smov 108   ;;  %s3284_s24 = smov 20   ;;  %vm1608_vm6 = vcmask 1039360  }
  0x31   : > { %v2865_v8 = vpack.c.bf16 %v376_v5, %v374_v3  ;;  %v2867_v9 = vpack.c.bf16 %v381_v7, %v379_v6  ;;  %v378_v10 = vld [vmem:[%s357_s11 + $0x20] sm:$0xff]  ;;  %v380_v11 = vld [vmem:[%s357_s11 + $0x30] sm:$0xff]  ;;  %v474_v34 = vld [vmem:[#allocation3 + $0x88] sm:$0xff]  ;;  %s3285_s25 = smov 107   ;;  %vm780_vm7 = vcmask 171008   ;;  %vm1774_vm8 = vcmask 891904  }
  0x32   : > { %2864 = vmatprep.subr.bf16.mxu0 %v2863_v4  ;;  %v2869_v15 = vpack.c.bf16 %v380_v11, %v378_v10  ;;  %v469_v30 = vld [vmem:[#allocation3 + $0x60] sm:$0xff]  ;;  %v478_v35 = vld [vmem:[#allocation3 + $0xa8] sm:$0xff]  ;;  %v467_v37 = vld [vmem:[#allocation3 + $0x50] sm:$0xff]  ;;  %vm1940_vm9 = vcmask 883712   ;;  %vm947_vm10 = vcmask 162816   ;;  %vm2106_vm11 = vcmask 875520  }
  0x33   : > { %2866 = vmatpush1.bf16.msra.mxu0 %v2865_v8  ;;  %v2877_v33 = vpack.c.bf16 %v469_v30, %v465_v29  ;;  %v471_v38 = vld [vmem:[#allocation3 + $0x70] sm:$0xff]  ;;  %v2879_v39 = vpack.c.bf16 %v478_v35, %v474_v34  ;;  %v473_v40 = vld [vmem:[#allocation3 + $0x80] sm:$0xff]  ;;  %v476_v41 = vld [vmem:[#allocation3 + $0x98] sm:$0xff]  ;;  %vm2712_vm12 = vcmask 556032  }
  0x34   : > { %2868 = vmatprep.subr.bf16.mxu0 %v2867_v9  ;;  %v480_v42 = vld [vmem:[#allocation3 + $0xb8] sm:$0xff]  ;;  %v477_v43 = vld [vmem:[#allocation3 + $0xa0] sm:$0xff]  ;;  %v482_v45 = vld [vmem:[#allocation3 + $0xc8] sm:$0xff]  ;;  %v2941_v47 = vpack.c.bf16 %v471_v38, %v467_v37 }
  0x35   : > { %2878 = vmatpush1.bf16.msra.mxu1 %v2877_v33  ;;  %v2881_v44 = vpack.c.bf16 %v477_v43, %v473_v40  ;;  %v486_v46 = vld [vmem:[#allocation3 + $0xe8] sm:$0xff]  ;;  %v481_v49 = vld [vmem:[#allocation3 + $0xc0] sm:$0xff]  ;;  %v2943_v51 = vpack.c.bf16 %v480_v42, %v476_v41  ;;  %v475_v52 = vld [vmem:[#allocation3 + $0x90] sm:$0xff] }
  0x36   : > { %2880 = vmatprep.subr.bf16.mxu1 %v2879_v39  ;;  %v2883_v48 = vpack.c.bf16 %v486_v46, %v482_v45  ;;  %v485_v50 = vld [vmem:[#allocation3 + $0xe0] sm:$0xff]  ;;  %v479_v53 = vld [vmem:[#allocation3 + $0xb0] sm:$0xff]  ;;  %v490_v54 = vld [vmem:[#allocation3 + $0x108] sm:$0xff] }
  0x37   : > { %2870 = vmatpush1.bf16.msra.mxu0 %v2869_v15  ;;  %v484_v55 = vld [vmem:[#allocation3 + $0xd8] sm:$0xff]  ;;  %v494_v57 = vld [vmem:[#allocation3 + $0x128] sm:$0xff]  ;;  %v2885_v58 = vpack.c.bf16 %v485_v50, %v481_v49  ;;  %v2945_v59 = vpack.c.bf16 %v479_v53, %v475_v52  ;;  %v483_v60 = vld [vmem:[#allocation3 + $0xd0] sm:$0xff] }
  0x38   : > { %2936 = vmatprep.subr.bf16.mxu0 %v2935_v20  ;;  %v488_v56 = vld [vmem:[#allocation3 + $0xf8] sm:$0xff]  ;;  %v2887_v61 = vpack.c.bf16 %v494_v57, %v490_v54  ;;  %v489_v62 = vld [vmem:[#allocation3 + $0x100] sm:$0xff]  ;;  %v487_v2 = vld [vmem:[#allocation3 + $0xf0] sm:$0xff] }
  0x39   : > { %2882 = vmatpush1.bf16.msra.mxu1 %v2881_v44  ;;  %v493_v63 = vld [vmem:[#allocation3 + $0x120] sm:$0xff]  ;;  %v2947_v1 = vpack.c.bf16 %v488_v56, %v484_v55  ;;  %v498_v3 = vld [vmem:[#allocation3 + $0x148] sm:$0xff]  ;;  %v492_v5 = vld [vmem:[#allocation3 + $0x118] sm:$0xff]  ;;  %v2949_v8 = vpack.c.bf16 %v487_v2, %v483_v60 }
  0x3a   : > { %2804 = vmatmul.mubr.msk.f32.vlgmr.msra.gmra.mrb[0].mxu0 %vm382_vm0, %v373_v31  ;;  %2884 = vmatprep.subr.bf16.mxu1 %v2883_v48  ;;  %v502_v4 = vld [vmem:[#allocation3 + $0x168] sm:$0xff]  ;;  %v496_v6 = vld [vmem:[#allocation3 + $0x138] sm:$0xff]  ;;  %v2889_v7 = vpack.c.bf16 %v493_v63, %v489_v62  ;;  %v491_v9 = vld [vmem:[#allocation3 + $0x110] sm:$0xff] }
  0x3b   : > { %2938 = vmatpush1.bf16.msra.mxu0 %v2937_v32  ;;  %v2891_v10 = vpack.c.bf16 %v502_v4, %v498_v3  ;;  %v497_v11 = vld [vmem:[#allocation3 + $0x140] sm:$0xff]  ;;  %v2951_v13 = vpack.c.bf16 %v496_v6, %v492_v5  ;;  %v495_v14 = vld [vmem:[#allocation3 + $0x130] sm:$0xff]  ;;  %v506_v15 = vld [vmem:[#allocation3 + $0x188] sm:$0xff] }
  0x3c   : > { %2940 = vmatprep.subr.bf16.mxu0 %v2939_v36  ;;  %v501_v12 = vld [vmem:[#allocation3 + $0x160] sm:$0xff]  ;;  %v510_v16 = vld [vmem:[#allocation3 + $0x1a8] sm:$0xff]  ;;  %v500_v17 = vld [vmem:[#allocation3 + $0x158] sm:$0xff]  ;;  %v2953_v20 = vpack.c.bf16 %v495_v14, %v491_v9 }
  0x3d   : > { %2886 = vmatpush1.bf16.msra.mxu1 %v2885_v58  ;;  %v504_v18 = vld [vmem:[#allocation3 + $0x178] sm:$0xff]  ;;  %v2893_v19 = vpack.c.bf16 %v501_v12, %v497_v11  ;;  %v499_v21 = vld [vmem:[#allocation3 + $0x150] sm:$0xff]  ;;  %v2895_v22 = vpack.c.bf16 %v510_v16, %v506_v15  ;;  %v505_v23 = vld [vmem:[#allocation3 + $0x180] sm:$0xff] }
  0x3e   : > { %2888 = vmatprep.subr.bf16.mxu1 %v2887_v61  ;;  %v509_v24 = vld [vmem:[#allocation3 + $0x1a0] sm:$0xff]  ;;  %v2955_v25 = vpack.c.bf16 %v504_v18, %v500_v17  ;;  %v503_v26 = vld [vmem:[#allocation3 + $0x170] sm:$0xff]  ;;  %v514_v27 = vld [vmem:[#allocation3 + $0x1c8] sm:$0xff] }
  0x3f   : > { %2942 = vmatpush1.bf16.msra.mxu0 %v2941_v47  ;;  %v518_v28 = vld [vmem:[#allocation3 + $0x1e8] sm:$0xff]  ;;  %v508_v29 = vld [vmem:[#allocation3 + $0x198] sm:$0xff]  ;;  %v2897_v31 = vpack.c.bf16 %v509_v24, %v505_v23  ;;  %v2957_v32 = vpack.c.bf16 %v503_v26, %v499_v21  ;;  %v507_v33 = vld [vmem:[#allocation3 + $0x190] sm:$0xff] }
  0x40   : > { %2944 = vmatprep.subr.bf16.mxu0 %v2943_v51  ;;  %v512_v30 = vld [vmem:[#allocation3 + $0x1b8] sm:$0xff]  ;;  %v2899_v34 = vpack.c.bf16 %v518_v28, %v514_v27  ;;  %v513_v35 = vld [vmem:[#allocation3 + $0x1c0] sm:$0xff]  ;;  %v511_v38 = vld [vmem:[#allocation3 + $0x1b0] sm:$0xff] }
  0x41   : > { %2890 = vmatpush1.bf16.msra.mxu1 %v2889_v7  ;;  %v517_v36 = vld [vmem:[#allocation3 + $0x1e0] sm:$0xff]  ;;  %v2959_v37 = vpack.c.bf16 %v512_v30, %v508_v29  ;;  %v522_v39 = vld [vmem:[#allocation3 + $0x208] sm:$0xff]  ;;  %v516_v41 = vld [vmem:[#allocation3 + $0x1d8] sm:$0xff]  ;;  %v2961_v44 = vpack.c.bf16 %v511_v38, %v507_v33 }
  0x42   : > { %2892 = vmatprep.subr.bf16.mxu1 %v2891_v10  ;;  %v526_v40 = vld [vmem:[#allocation3 + $0x228] sm:$0xff]  ;;  %v520_v42 = vld [vmem:[#allocation3 + $0x1f8] sm:$0xff]  ;;  %v2901_v43 = vpack.c.bf16 %v517_v36, %v513_v35  ;;  %v515_v45 = vld [vmem:[#allocation3 + $0x1d0] sm:$0xff] }
  0x43   : > { %2946 = vmatpush1.bf16.msra.mxu0 %v2945_v59  ;;  %v2903_v46 = vpack.c.bf16 %v526_v40, %v522_v39  ;;  %v521_v47 = vld [vmem:[#allocation3 + $0x200] sm:$0xff]  ;;  %v2963_v49 = vpack.c.bf16 %v520_v42, %v516_v41  ;;  %v519_v50 = vld [vmem:[#allocation3 + $0x1f0] sm:$0xff]  ;;  %v530_v51 = vld [vmem:[#allocation3 + $0x248] sm:$0xff] }
  0x44   : > { %2948 = vmatprep.subr.bf16.mxu0 %v2947_v1  ;;  %v525_v48 = vld [vmem:[#allocation3 + $0x220] sm:$0xff]  ;;  %v534_v52 = vld [vmem:[#allocation3 + $0x268] sm:$0xff]  ;;  %v524_v53 = vld [vmem:[#allocation3 + $0x218] sm:$0xff]  ;;  %v2965_v56 = vpack.c.bf16 %v519_v50, %v515_v45 }
  0x45   : > { %2894 = vmatpush1.bf16.msra.mxu1 %v2893_v19  ;;  %v528_v54 = vld [vmem:[#allocation3 + $0x238] sm:$0xff]  ;;  %v2905_v55 = vpack.c.bf16 %v525_v48, %v521_v47  ;;  %v523_v57 = vld [vmem:[#allocation3 + $0x210] sm:$0xff]  ;;  %v2907_v58 = vpack.c.bf16 %v534_v52, %v530_v51  ;;  %v529_v59 = vld [vmem:[#allocation3 + $0x240] sm:$0xff] }
  0x46   : > { %2896 = vmatprep.subr.bf16.mxu1 %v2895_v22  ;;  %v533_v60 = vld [vmem:[#allocation3 + $0x260] sm:$0xff]  ;;  %v2967_v61 = vpack.c.bf16 %v528_v54, %v524_v53  ;;  %v527_v62 = vld [vmem:[#allocation3 + $0x230] sm:$0xff]  ;;  %v538_v63 = vld [vmem:[#allocation3 + $0x288] sm:$0xff] }
  0x47   : > { %2950 = vmatpush1.bf16.msra.mxu0 %v2949_v8  ;;  %v542_v1 = vld [vmem:[#allocation3 + $0x2a8] sm:$0xff]  ;;  %v532_v2 = vld [vmem:[#allocation3 + $0x258] sm:$0xff]  ;;  %v2909_v4 = vpack.c.bf16 %v533_v60, %v529_v59  ;;  %v2969_v5 = vpack.c.bf16 %v527_v62, %v523_v57  ;;  %v531_v6 = vld [vmem:[#allocation3 + $0x250] sm:$0xff] }
  0x48   : > { %2952 = vmatprep.subr.bf16.mxu0 %v2951_v13  ;;  %v536_v3 = vld [vmem:[#allocation3 + $0x278] sm:$0xff]  ;;  %v2911_v7 = vpack.c.bf16 %v542_v1, %v538_v63  ;;  %v537_v8 = vld [vmem:[#allocation3 + $0x280] sm:$0xff]  ;;  %v535_v11 = vld [vmem:[#allocation3 + $0x270] sm:$0xff] }
  0x49   : > { %2898 = vmatpush1.bf16.msra.mxu1 %v2897_v31  ;;  %v541_v9 = vld [vmem:[#allocation3 + $0x2a0] sm:$0xff]  ;;  %v2971_v10 = vpack.c.bf16 %v536_v3, %v532_v2  ;;  %v546_v12 = vld [vmem:[#allocation3 + $0x2c8] sm:$0xff]  ;;  %v540_v14 = vld [vmem:[#allocation3 + $0x298] sm:$0xff]  ;;  %v2973_v17 = vpack.c.bf16 %v535_v11, %v531_v6 }
  0x4a   : > { %2900 = vmatprep.subr.bf16.mxu1 %v2899_v34  ;;  %v550_v13 = vld [vmem:[#allocation3 + $0x2e8] sm:$0xff]  ;;  %v544_v15 = vld [vmem:[#allocation3 + $0x2b8] sm:$0xff]  ;;  %v2913_v16 = vpack.c.bf16 %v541_v9, %v537_v8  ;;  %v539_v18 = vld [vmem:[#allocation3 + $0x290] sm:$0xff] }
  0x4b   : > { %2954 = vmatpush1.bf16.msra.mxu0 %v2953_v20  ;;  %v2915_v19 = vpack.c.bf16 %v550_v13, %v546_v12  ;;  %v545_v20 = vld [vmem:[#allocation3 + $0x2c0] sm:$0xff]  ;;  %v2975_v22 = vpack.c.bf16 %v544_v15, %v540_v14  ;;  %v543_v23 = vld [vmem:[#allocation3 + $0x2b0] sm:$0xff]  ;;  %v554_v24 = vld [vmem:[#allocation3 + $0x308] sm:$0xff] }
  0x4c   : > { %2956 = vmatprep.subr.bf16.mxu0 %v2955_v25  ;;  %v549_v21 = vld [vmem:[#allocation3 + $0x2e0] sm:$0xff]  ;;  %v558_v25 = vld [vmem:[#allocation3 + $0x328] sm:$0xff]  ;;  %v548_v26 = vld [vmem:[#allocation3 + $0x2d8] sm:$0xff]  ;;  %v2977_v29 = vpack.c.bf16 %v543_v23, %v539_v18  ;;  %v3277_v18 = vmov 0  }
  0x4d   : > { %2902 = vmatpush1.bf16.msra.mxu1 %v2901_v43  ;;  %v552_v27 = vld [vmem:[#allocation3 + $0x2f8] sm:$0xff]  ;;  %v2917_v28 = vpack.c.bf16 %v549_v21, %v545_v20  ;;  %v547_v30 = vld [vmem:[#allocation3 + $0x2d0] sm:$0xff]  ;;  %v2919_v31 = vpack.c.bf16 %v558_v25, %v554_v24  ;;  %v557_v33 = vld [vmem:[#allocation3 + $0x320] sm:$0xff]  ;;  %3231 = vset.pattern.permute.xlu0 %v3277_v18  ;;  %v593_v21 = vlaneseq }
  0x4e   : > { %2904 = vmatprep.subr.bf16.mxu1 %v2903_v46  ;;  %v2979_v34 = vpack.c.bf16 %v552_v27, %v548_v26  ;;  %v551_v35 = vld [vmem:[#allocation3 + $0x2f0] sm:$0xff]  ;;  %v562_v36 = vld [vmem:[#allocation3 + $0x348] sm:$0xff]  ;;  %v556_v38 = vld [vmem:[#allocation3 + $0x318] sm:$0xff] }
  0x4f   : > { %2958 = vmatpush1.bf16.msra.mxu0 %v2957_v32  ;;  %v553_v32 = vld [vmem:[#allocation3 + $0x300] sm:$0xff]  ;;  %v560_v39 = vld [vmem:[#allocation3 + $0x338] sm:$0xff]  ;;  %v2981_v41 = vpack.c.bf16 %v551_v35, %v547_v30  ;;  %v555_v42 = vld [vmem:[#allocation3 + $0x310] sm:$0xff] }
  0x50   : > { %2960 = vmatprep.subr.bf16.mxu0 %v2959_v37  ;;  %v566_v37 = vld [vmem:[#allocation3 + $0x368] sm:$0xff]  ;;  %v2921_v40 = vpack.c.bf16 %v557_v33, %v553_v32  ;;  %v565_v45 = vld [vmem:[#allocation3 + $0x360] sm:$0xff]  ;;  %v2983_v46 = vpack.c.bf16 %v560_v39, %v556_v38  ;;  %v559_v47 = vld [vmem:[#allocation3 + $0x330] sm:$0xff] }
  0x51   : > { %2906 = vmatpush1.bf16.msra.mxu1 %v2905_v55  ;;  %v2923_v43 = vpack.c.bf16 %v566_v37, %v562_v36  ;;  %v570_v48 = vld [vmem:[#allocation3 + $0x388] sm:$0xff]  ;;  %v564_v50 = vld [vmem:[#allocation3 + $0x358] sm:$0xff]  ;;  %v2985_v53 = vpack.c.bf16 %v559_v47, %v555_v42  ;;  %v563_v54 = vld [vmem:[#allocation3 + $0x350] sm:$0xff] }
  0x52   : > { %2908 = vmatprep.subr.bf16.mxu1 %v2907_v58  ;;  %v568_v51 = vld [vmem:[#allocation3 + $0x378] sm:$0xff]  ;;  %v573_v57 = vld [vmem:[#allocation3 + $0x3a0] sm:$0xff]  ;;  %v567_v59 = vld [vmem:[#allocation3 + $0x370] sm:$0xff] }
  0x53   : > { %2962 = vmatpush1.bf16.msra.mxu0 %v2961_v44  ;;  %v561_v44 = vld [vmem:[#allocation3 + $0x340] sm:$0xff]  ;;  %v2987_v58 = vpack.c.bf16 %v568_v51, %v564_v50  ;;  %v578_v60 = vld [vmem:[#allocation3 + $0x3c8] sm:$0xff]  ;;  %v572_v62 = vld [vmem:[#allocation3 + $0x398] sm:$0xff]  ;;  %v2989_v2 = vpack.c.bf16 %v567_v59, %v563_v54 }
  0x54   : > { %2964 = vmatprep.subr.bf16.mxu0 %v2963_v49  ;;  %v574_v49 = vld [vmem:[#allocation3 + $0x3a8] sm:$0xff]  ;;  %v2925_v52 = vpack.c.bf16 %v565_v45, %v561_v44  ;;  %v576_v63 = vld [vmem:[#allocation3 + $0x3b8] sm:$0xff]  ;;  %v575_v6 = vld [vmem:[#allocation3 + $0x3b0] sm:$0xff] }
  0x55   : > { %2910 = vmatpush1.bf16.msra.mxu1 %v2909_v4  ;;  %v2927_v55 = vpack.c.bf16 %v574_v49, %v570_v48  ;;  %v2991_v4 = vpack.c.bf16 %v576_v63, %v572_v62  ;;  %v584_v8 = vld [vmem:[#allocation3 + $0x3f8] sm:$0xff]  ;;  %v577_v11 = vld [vmem:[#allocation3 + $0x3c0] sm:$0xff]  ;;  %v579_v13 = vld [vmem:[#allocation3 + $0x3d0] sm:$0xff] }
  0x56   : > { %2912 = vmatprep.subr.bf16.mxu1 %v2911_v7  ;;  %v580_v7 = vld [vmem:[#allocation3 + $0x3d8] sm:$0xff]  ;;  %v581_v12 = vld [vmem:[#allocation3 + $0x3e0] sm:$0xff]  ;;  %v583_v15 = vld [vmem:[#allocation3 + $0x3f0] sm:$0xff] }
  0x57   : > { %2966 = vmatpush1.bf16.msra.mxu0 %v2965_v56  ;;  %v569_v56 = vld [vmem:[#allocation3 + $0x380] sm:$0xff]  ;;  %v2933_v14 = vpack.c.bf16 %v581_v12, %v577_v11  ;;  %v586_v25 = vld [vmem:[%s4010_s6] sm:$0xf]  ;;  %v1275_v63 = vld [vmem:[%s4008_s4 + $0x18] sm:$0xff] }
  0x58   : > { %2968 = vmatprep.subr.bf16.mxu0 %v2967_v61  ;;  %v582_v61 = vld [vmem:[#allocation3 + $0x3e8] sm:$0xff]  ;;  %v2929_v1 = vpack.c.bf16 %v573_v57, %v569_v56 }
  0x59   : > { %2914 = vmatpush1.bf16.msra.mxu1 %v2913_v16  ;;  %v2931_v3 = vpack.c.bf16 %v582_v61, %v578_v60  ;;  %v2997_v16 = vpack.c.bf16 %v583_v15, %v579_v13  ;;  %v1599_v15 = vld [vmem:[%s4008_s4 + $0x28] sm:$0xff] }
  0x5a   : > { %2916 = vmatprep.subr.bf16.mxu1 %v2915_v19 }
  0x5b   : > { %2970 = vmatpush1.bf16.msra.mxu0 %v2969_v5  ;;  %v571_v5 = vld [vmem:[#allocation3 + $0x390] sm:$0xff] }
  0x5c   : > { %2972 = vmatprep.subr.bf16.mxu0 %v2971_v10  ;;  %v2993_v9 = vpack.c.bf16 %v575_v6, %v571_v5  ;;  %v2995_v10 = vpack.c.bf16 %v584_v8, %v580_v7  ;;  %v1449_v8 = vld [vmem:[%s4008_s4 + $0x20] sm:$0xff] }
  0x5d   : > { %2918 = vmatpush1.bf16.msra.mxu1 %v2917_v28 }
  0x5e   : > { %2920 = vmatprep.subr.bf16.mxu1 %v2919_v31 }
  0x5f   : > { %2974 = vmatpush1.bf16.msra.mxu0 %v2973_v17  ;;  %v585_v17 = vld [vmem:[%s4007_s3] sm:$0xff] }
  0x60   : > { %2976 = vmatprep.subr.bf16.mxu0 %v2975_v22  ;;  %589 = vperm.xlu0 %3231, %v585_v17   ;;  %v594_v22 = vshrl.u32 %v593_v21, 7 }
  0x61   : > { %2922 = vmatpush1.bf16.msra.mxu1 %v2921_v40 }
  0x62   : > { %2924 = vmatprep.subr.bf16.mxu1 %v2923_v43  ;;  %v595_v23 = vsub.s32 0, %v594_v22  ;;  %v603_v24 = vsub.s32 2, %v594_v22  ;;  %v599_v26 = vsub.s32 1, %v594_v22  ;;  %v607_v27 = vsub.s32 3, %v594_v22 }
  0x63   : > { %2978 = vmatpush1.bf16.msra.mxu0 %v2977_v29 }
  0x64   : > { %2980 = vmatprep.subr.bf16.mxu0 %v2979_v34  ;;  %v596_v28 = vrot.slane %v586_v25, %v595_v23  ;;  %v604_v29 = vrot.slane %v586_v25, %v603_v24  ;;  %v600_v31 = vrot.slane %v586_v25, %v599_v26  ;;  %v608_v32 = vrot.slane %v586_v25, %v607_v27  ;;  %v1765_v26 = vld [vmem:[%s4008_s4 + $0x30] sm:$0xff] }
  0x65   : > { %2926 = vmatpush1.bf16.msra.mxu1 %v2925_v52 }
  0x66   : > { %2928 = vmatprep.subr.bf16.mxu1 %v2927_v55 }
  0x67   : > { %2982 = vmatpush1.bf16.msra.mxu0 %v2981_v41 }
  0x68   : > { %2984 = vmatprep.subr.bf16.mxu0 %v2983_v46  ;;  %v2413_v46 = vld [vmem:[%s4009_s5] sm:$0xff] }
  0x69   : > { %2930 = vmatpush1.bf16.msra.mxu1 %v2929_v1 }
  0x6a   : > { %2932 = vmatprep.subr.bf16.mxu1 %v2931_v3 }
  0x6b   : > { %2986 = vmatpush1.bf16.msra.mxu0 %v2985_v53  ;;  %v1104_v53 = vld [vmem:[%s4008_s4 + $0x10] sm:$0xff] }
  0x6c   : > { %2988 = vmatprep.subr.bf16.mxu0 %v2987_v58 }
  0x6d   : > { %2934 = vmatpush1.bf16.msra.mxu1 %v2933_v14 }
  0x6f   : > { %2990 = vmatpush1.bf16.msra.mxu0 %v2989_v2 }
  0x70   : > { %2992 = vmatprep.subr.bf16.mxu0 %v2991_v4 }
  0x73   : > { %2994 = vmatpush1.bf16.msra.mxu0 %v2993_v9 }
  0x74   : > { %2996 = vmatprep.subr.bf16.mxu0 %v2995_v10 }
  0x77   : > { %2998 = vmatpush1.bf16.msra.mxu0 %v2997_v16 }
  0x9e   : > { %v1106_v47 = vpop.permute.xlu1 %1105 }
  0xdf   : > { %v590_v30 = vpop.permute.xlu0 %589 }
  0xe0   : > { %v613_v33 = vmul.f32 %v596_v28, %v590_v30  ;;  %v615_v34 = vmul.f32 %v604_v29, %v590_v30  ;;  %v614_v35 = vmul.f32 %v600_v31, %v590_v30  ;;  %v616_v36 = vmul.f32 %v608_v32, %v590_v30 }
 0x10d   : > { %v452_v19 = vpop.f32.mrb[0].mxu0 }
 0x10e   : > { %v454_v20 = vpop.f32.mrb[1].mxu0 }
 0x10f   : > { %681 = vmatprep.mubr.f32.mxu1 %v454_v20  ;;  %752 = vmatprep.mubr.f32.mxu0 %v454_v20  ;;  %v767_v20 = vld [vmem:[%s4008_s4] sm:$0xff] }
 0x110   : > { %682 = vmatmul.mubr.f32.vlgmr.msra.gmra.mrb[0].mxu1 %v452_v19  ;;  %753 = vmatmul.mubr.f32.vlgmr.msra.gmra.mrb[2].mxu0 %v452_v19 }
 0x111   : > { %1188 = vmatprep.mubr.f32.mxu1 %v3276_v0  ;;  %856 = vmatprep.mubr.f32.mxu0 %v3276_v0 }
 0x1e3   : > { %v683_v37 = vpop.f32.mrb[0].mxu1  ;;  %v754_v38 = vpop.f32.mrb[2].mxu0 }
 0x1e4   : > { %v3406_v39 = vadd.f32 %v683_v37, %v613_v33  ;;  %v3408_v40 = vadd.f32 %v754_v38, %v615_v34  ;;  %v685_v41 = vpop.f32.mrb[1].mxu1  ;;  %v756_v42 = vpop.f32.mrb[3].mxu0 }
 0x1e5   : > { %v3410_v43 = vadd.f32 %v685_v41, %v614_v35  ;;  %v3412_v44 = vadd.f32 %v756_v42, %v616_v36  ;;  %v1931_v36 = vld [vmem:[%s4008_s4 + $0x38] sm:$0xff]  ;;  %v938_v42 = vld [vmem:[%s4008_s4 + $0x8] sm:$0xff] }
 0x1e6   : > { %1107 = vrot.lane.b32.xlu0 %v3406_v39, %s3278_s16  ;;  %1283 = vrot.lane.b32.xlu1 %v3406_v39, %s3279_s19 }
 0x1e7   : > { %762 = vst.msk [vmem:[#allocation2 + $0x20] sm:$0xff] %vm371_vm2, %v3412_v44 }
 0x1ea   : > { %1111 = vrot.lane.b32.xlu0 %v3408_v40, %s3278_s16  ;;  %1109 = vrot.lane.b32.xlu1 %v3410_v43, %s3278_s16 }
 0x1ee   : > { %1287 = vrot.lane.b32.xlu0 %v3408_v40, %s3279_s19  ;;  %1281 = vrot.lane.b32.xlu1 %v3276_v0, %s3279_s19  ;;  %v1274_v45 = vld [vmem:[#allocation2 + $0x20] sm:$0xff] }
 0x1f2   : > { %1600 = vrot.lane.b32.xlu0 %v3406_v39, %s3280_s20  ;;  %1604 = vrot.lane.b32.xlu1 %v3408_v40, %s3280_s20 }
 0x1f6   : > { %1285 = vrot.lane.b32.xlu0 %v3410_v43, %s3279_s19  ;;  %1289 = vrot.lane.b32.xlu1 %v1274_v45, %s3279_s19 }
 0x1fa   : > { %1766 = vrot.lane.b32.xlu0 %v3406_v39, %s3281_s21  ;;  %1770 = vrot.lane.b32.xlu1 %v3408_v40, %s3281_s21 }
 0x1fe   : > { %774 = vrot.lane.b32.xlu0 %v3406_v39, %s3282_s22  ;;  %1932 = vrot.lane.b32.xlu1 %v3406_v39, %s3283_s23 }
 0x202   : > { %772 = vrot.lane.b32.xlu0 %v3276_v0, %s3282_s22  ;;  %1606 = vrot.lane.b32.xlu1 %v1274_v45, %s3280_s20 }
 0x206   : > { %1602 = vrot.lane.b32.xlu0 %v3410_v43, %s3280_s20  ;;  %1772 = vrot.lane.b32.xlu1 %v1274_v45, %s3281_s21 }
 0x20a   : > { %1936 = vrot.lane.b32.xlu0 %v3408_v40, %s3283_s23  ;;  %776 = vrot.lane.b32.xlu1 %v3410_v43, %s3282_s22 }
 0x20e   : > { %1768 = vrot.lane.b32.xlu0 %v3410_v43, %s3281_s21  ;;  %1934 = vrot.lane.b32.xlu1 %v3410_v43, %s3283_s23 }
 0x212   : > { %778 = vrot.lane.b32.xlu0 %v3408_v40, %s3282_s22  ;;  %1938 = vrot.lane.b32.xlu1 %v1274_v45, %s3283_s23  ;;  %s3198_s23 = smul.u32 24, %s4022_s10 }
 0x214   : > { %s362_s26 = scalar_lea.vmem %s4005_s1, %s3198_s23  ;;  %s367_s29 = scalar_lea.vmem %s4013_s9, %s3198_s23 }
 0x216   : > { %941 = vrot.lane.b32.xlu0 %v3406_v39, %s3284_s24  ;;  %943 = vrot.lane.b32.xlu1 %v3410_v43, %s3284_s24 }
 0x21a   : > { %939 = vrot.lane.b32.xlu0 %v3276_v0, %s3284_s24  ;;  %2100 = vrot.lane.b32.xlu1 %v3410_v43, %s3285_s25 }
 0x21e   : > { %2102 = vrot.lane.b32.xlu0 %v3408_v40, %s3285_s25  ;;  %2098 = vrot.lane.b32.xlu1 %v3406_v39, %s3285_s25 }
 0x222   : > { %945 = vrot.lane.b32.xlu0 %v3408_v40, %s3284_s24  ;;  %2104 = vrot.lane.b32.xlu1 %v1274_v45, %s3285_s25 }
 0x226   : > { %2416 = vperm.xlu0 %3231, %v2413_v46  }
 0x258   : > { %v1108_v48 = vpop.permute.xlu0 %1107  ;;  %v1284_v49 = vpop.permute.xlu1 %1283 }
 0x259   : > { %v1114_v54 = vsel %vm1113_vm3, %v1106_v47, %v1108_v48 }
 0x25c   : > { %v1112_v50 = vpop.permute.xlu0 %1111  ;;  %v1110_v51 = vpop.permute.xlu1 %1109 }
 0x25d   : > { %v1115_v52 = vsel %vm1113_vm3, %v1108_v48, %v1110_v51  ;;  %v1116_v55 = vsel %vm1113_vm3, %v1110_v51, %v1112_v50  ;;  %v2097_v48 = vld [vmem:[%s4008_s4 + $0x40] sm:$0xff] }
 0x25e   : > { %1124 = vmatprep.subr.mxu1 %v1115_v52  ;;  %v2267_v52 = vld [vmem:[%s4012_s8 + $0x20] sm:$0xff] }
 0x25f   : > { %1125 = vmatpush1.msra.mxu1 %v1114_v54  ;;  %v2266_v54 = vld [vmem:[%s4012_s8 + $0x18] sm:$0xff] }
 0x260   : > { %v1288_v56 = vpop.permute.xlu0 %1287  ;;  %1195 = vmatprep.subr.mxu1 %v1112_v50  ;;  %v1282_v57 = vpop.permute.xlu1 %1281  ;;  %2809 = vmatmul.mubr.msk.f32.vlgmr.msra.gmra.mrb[2].mxu1 %vm788_vm4, %v1104_v53 }
 0x261   : > { %1196 = vmatpush1.msra.mxu1 %v1116_v55  ;;  %1259 = vmatprep.mubr.f32.mxu1 %v3276_v0  ;;  %v1292_v1 = vsel %vm1291_vm5, %v1282_v57, %v1284_v49  ;;  %v2270_v55 = vld [vmem:[%s4012_s8 + $0x38] sm:$0xff]  ;;  %v2273_v57 = vld [vmem:[%s4012_s8 + $0x50] sm:$0xff] }
 0x264   : > { %v1601_v58 = vpop.permute.xlu0 %1600  ;;  %v1605_v59 = vpop.permute.xlu1 %1604  ;;  %2810 = vmatmul.mubr.msk.f32.vlgmr.msra.gmra.mrb[4].mxu1 %vm788_vm4, %v1104_v53  ;;  %v2263_v53 = vld [vmem:[%s4012_s8] sm:$0xff] }
 0x265   : > { %1367 = vmatprep.mubr.f32.mxu1 %v3276_v0 }
 0x268   : > { %v1286_v60 = vpop.permute.xlu0 %1285  ;;  %v1290_v61 = vpop.permute.xlu1 %1289 }
 0x269   : > { %v1293_v62 = vsel %vm1291_vm5, %v1284_v49, %v1286_v60  ;;  %v1295_v2 = vsel %vm1291_vm5, %v1288_v56, %v1290_v61  ;;  %v1294_v3 = vsel %vm1291_vm5, %v1286_v60, %v1288_v56  ;;  %v2264_v49 = vld [vmem:[%s4012_s8 + $0x8] sm:$0xff] }
 0x26a   : > { %1303 = vmatprep.subr.mxu1 %v1293_v62  ;;  %v2316_v56 = vld [vmem:[%s4012_s8 + $0x1a8] sm:$0xff]  ;;  %v2999_v62 = vpack.c.bf16 %v2267_v52, %v2264_v49  ;;  %v2290_v49 = vld [vmem:[%s4012_s8 + $0xd8] sm:$0xff]  ;;  %v2297_v52 = vld [vmem:[%s4012_s8 + $0x110] sm:$0xff] }
 0x26b   : > { %1304 = vmatpush1.msra.mxu1 %v1292_v1  ;;  %v2319_v1 = vld [vmem:[%s4012_s8 + $0x1c0] sm:$0xff] }
 0x26c   : > { %v1767_v4 = vpop.permute.xlu0 %1766  ;;  %2811 = vmatmul.mubr.msk.f32.vlgmr.msra.gmra.mrb[2].mxu1 %vm788_vm4, %v1275_v63  ;;  %1374 = vmatprep.subr.mxu1 %v1295_v2  ;;  %v1771_v5 = vpop.permute.xlu1 %1770  ;;  %v2322_v2 = vld [vmem:[%s4012_s8 + $0x1d8] sm:$0xff] }
 0x26d   : > { %1375 = vmatpush1.msra.mxu1 %v1294_v3  ;;  %1438 = vmatprep.mubr.f32.mxu1 %v3276_v0 }
 0x26e   : > { %1453 = vmatprep.subr.mxu1 %v3410_v43 }
 0x270   : > { %v775_v6 = vpop.permute.xlu0 %774  ;;  %2812 = vmatmul.mubr.msk.f32.vlgmr.msra.gmra.mrb[4].mxu1 %vm788_vm4, %v1275_v63  ;;  %v1933_v7 = vpop.permute.xlu1 %1932  ;;  %v3001_v63 = vpack.c.bf16 %v2266_v54, %v2263_v53  ;;  %v2289_v54 = vld [vmem:[%s4012_s8 + $0xd0] sm:$0xff] }
 0x271   : > { %1454 = vmatpush1.msra.mxu1 %v3406_v39  ;;  %1517 = vmatprep.mubr.f32.mxu1 %v3276_v0 }
 0x272   : > { %1524 = vmatprep.subr.mxu1 %v3412_v44 }
 0x274   : > { %v773_v9 = vpop.permute.xlu0 %772  ;;  %2813 = vmatmul.mubr.msk.f32.vlgmr.msra.gmra.mrb[2].mxu1 %vm788_vm4, %v1449_v8  ;;  %v1607_v10 = vpop.permute.xlu1 %1606 }
 0x275   : > { %1525 = vmatpush1.msra.mxu1 %v3408_v40  ;;  %1588 = vmatprep.mubr.f32.mxu1 %v3276_v0  ;;  %v1611_v16 = vsel %vm1608_vm6, %v1605_v59, %v1607_v10  ;;  %v781_v21 = vsel %vm780_vm7, %v773_v9, %v775_v6  ;;  %v2276_v9 = vld [vmem:[%s4012_s8 + $0x68] sm:$0xff] }
 0x278   : > { %v1603_v11 = vpop.permute.xlu0 %1602  ;;  %2814 = vmatmul.mubr.msk.f32.vlgmr.msra.gmra.mrb[4].mxu1 %vm788_vm4, %v1449_v8  ;;  %v1773_v12 = vpop.permute.xlu1 %1772  ;;  %v2272_v8 = vld [vmem:[%s4012_s8 + $0x48] sm:$0xff] }
 0x279   : > { %v1609_v13 = vsel %vm1608_vm6, %v1601_v58, %v1603_v11  ;;  %v1610_v14 = vsel %vm1608_vm6, %v1603_v11, %v1605_v59  ;;  %1683 = vmatprep.mubr.f32.mxu1 %v3276_v0  ;;  %v1777_v27 = vsel %vm1774_vm8, %v1771_v5, %v1773_v12  ;;  %v2265_v58 = vld [vmem:[%s4012_s8 + $0x10] sm:$0xff]  ;;  %v2268_v59 = vld [vmem:[%s4012_s8 + $0x28] sm:$0xff]  ;;  %v3232_v11 = vld [vmem:[#allocation2] sm:$0xff] }
 0x27a   : > { %1619 = vmatprep.subr.mxu1 %v1610_v14  ;;  %v2271_v14 = vld [vmem:[%s4012_s8 + $0x40] sm:$0xff] }
 0x27b   : > { %1620 = vmatpush1.msra.mxu1 %v1609_v13  ;;  %v3103_v13 = vpack.c.bf16 %v2322_v2, %v2319_v1  ;;  %v2295_v2 = vld [vmem:[%s4012_s8 + $0x100] sm:$0xff] }
 0x27c   : > { %v1937_v17 = vpop.permute.xlu0 %1936  ;;  %2815 = vmatmul.mubr.msk.f32.vlgmr.msra.gmra.mrb[2].mxu1 %vm788_vm4, %v1599_v15  ;;  %1690 = vmatprep.subr.mxu1 %v1607_v10  ;;  %v777_v18 = vpop.permute.xlu1 %776  ;;  %v3101_v10 = vpack.c.bf16 %v2268_v59, %v2265_v58  ;;  %v2293_v59 = vld [vmem:[%s4012_s8 + $0xf0] sm:$0xff] }
 0x27d   : > { %1691 = vmatpush1.msra.mxu1 %v1611_v16  ;;  %v782_v19 = vsel %vm780_vm7, %v775_v6, %v777_v18  ;;  %1754 = vmatprep.mubr.f32.mxu1 %v3276_v0  ;;  %v3003_v6 = vpack.c.bf16 %v2273_v57, %v2270_v55  ;;  %v2325_v16 = vld [vmem:[%s4012_s8 + $0x1f0] sm:$0xff]  ;;  %v2292_v55 = vld [vmem:[%s4012_s8 + $0xe8] sm:$0xff] }
 0x27e   : > { %792 = vmatprep.subr.mxu0 %v782_v19 }
 0x27f   : > { %793 = vmatpush1.msra.mxu0 %v781_v21  ;;  %v2278_v21 = vld [vmem:[%s4012_s8 + $0x78] sm:$0xff] }
 0x280   : > { %v1769_v22 = vpop.permute.xlu0 %1768  ;;  %2816 = vmatmul.mubr.msk.f32.vlgmr.msra.gmra.mrb[4].mxu1 %vm788_vm4, %v1599_v15  ;;  %v1935_v23 = vpop.permute.xlu1 %1934  ;;  %2805 = vmatmul.mubr.msk.f32.vlgmr.msra.gmra.mrb[4].mxu0 %vm788_vm4, %v767_v20  ;;  %v2274_v15 = vld [vmem:[%s4012_s8 + $0x58] sm:$0xff] }
 0x281   : > { %v1775_v24 = vsel %vm1774_vm8, %v1767_v4, %v1769_v22  ;;  %v1776_v25 = vsel %vm1774_vm8, %v1769_v22, %v1771_v5  ;;  %1849 = vmatprep.mubr.f32.mxu1 %v3276_v0  ;;  %927 = vmatprep.mubr.f32.mxu0 %v3276_v0  ;;  %v1942_v31 = vsel %vm1940_vm9, %v1935_v23, %v1937_v17  ;;  %v2282_v22 = vld [vmem:[%s4012_s8 + $0x98] sm:$0xff] }
 0x282   : > { %1785 = vmatprep.subr.mxu1 %v1776_v25  ;;  %v1941_v32 = vsel %vm1940_vm9, %v1933_v7, %v1935_v23  ;;  %v2269_v7 = vld [vmem:[%s4012_s8 + $0x30] sm:$0xff]  ;;  %v3105_v23 = vpack.c.bf16 %v2274_v15, %v2271_v14  ;;  %v2308_v14 = vld [vmem:[%s4012_s8 + $0x168] sm:$0xff] }
 0x283   : > { %1786 = vmatpush1.msra.mxu1 %v1775_v24  ;;  %v2285_v24 = vld [vmem:[%s4012_s8 + $0xb0] sm:$0xff]  ;;  %v2312_v15 = vld [vmem:[%s4012_s8 + $0x188] sm:$0xff] }
 0x284   : > { %v779_v28 = vpop.permute.xlu0 %778  ;;  %2817 = vmatmul.mubr.msk.f32.vlgmr.msra.gmra.mrb[2].mxu1 %vm788_vm4, %v1765_v26  ;;  %1856 = vmatprep.subr.mxu1 %v1773_v12  ;;  %v1939_v29 = vpop.permute.xlu1 %1938  ;;  %v2279_v12 = vld [vmem:[%s4012_s8 + $0x80] sm:$0xff] }
 0x285   : > { %v783_v30 = vsel %vm780_vm7, %v777_v18, %v779_v28  ;;  %863 = vmatprep.subr.mxu0 %v779_v28  ;;  %1857 = vmatpush1.msra.mxu1 %v1777_v27  ;;  %v1943_v37 = vsel %vm1940_vm9, %v1937_v17, %v1939_v29  ;;  %v2328_v17 = vld [vmem:[%s4012_s8 + $0x208] sm:$0xff]  ;;  %v3005_v18 = vpack.c.bf16 %v2272_v8, %v2269_v7  ;;  %v2331_v28 = vld [vmem:[%s4012_s8 + $0x220] sm:$0xff]  ;;  %v2302_v7 = vld [vmem:[%s4012_s8 + $0x138] sm:$0xff] }
 0x286   : > { %864 = vmatpush1.msra.mxu0 %v783_v30  ;;  %1951 = vmatprep.subr.mxu1 %v1942_v31  ;;  %v3007_v19 = vpack.c.bf16 %v2279_v12, %v2276_v9  ;;  %v3107_v25 = vpack.c.bf16 %v2328_v17, %v2325_v16  ;;  %v2280_v27 = vld [vmem:[%s4012_s8 + $0x88] sm:$0xff]  ;;  %v3011_v31 = vpack.c.bf16 %v2285_v24, %v2282_v22  ;;  %v2306_v9 = vld [vmem:[%s4012_s8 + $0x158] sm:$0xff]  ;;  %v2315_v16 = vld [vmem:[%s4012_s8 + $0x1a0] sm:$0xff] }
 0x287   : > { %1920 = vmatprep.mubr.f32.mxu1 %v3276_v0  ;;  %2806 = vmatmul.mubr.msk.f32.vlgmr.msra.gmra.mrb[6].mxu0 %vm788_vm4, %v767_v20  ;;  %v2275_v20 = vld [vmem:[%s4012_s8 + $0x60] sm:$0xff]  ;;  %v2321_v22 = vld [vmem:[%s4012_s8 + $0x1d0] sm:$0xff] }
 0x288   : > { %v942_v33 = vpop.permute.xlu0 %941  ;;  %2818 = vmatmul.mubr.msk.f32.vlgmr.msra.gmra.mrb[4].mxu1 %vm788_vm4, %v1765_v26  ;;  %v944_v34 = vpop.permute.xlu1 %943  ;;  %1022 = vmatprep.mubr.f32.mxu0 %v3276_v0  ;;  %v2277_v26 = vld [vmem:[%s4012_s8 + $0x70] sm:$0xff]  ;;  %v3009_v30 = vpack.c.bf16 %v2278_v21, %v2275_v20  ;;  %v2314_v20 = vld [vmem:[%s4012_s8 + $0x198] sm:$0xff] }
 0x289   : > { %1952 = vmatpush1.msra.mxu1 %v1941_v32  ;;  %v949_v35 = vsel %vm947_vm10, %v942_v33, %v944_v34  ;;  %2015 = vmatprep.mubr.f32.mxu1 %v3276_v0  ;;  %v2281_v32 = vld [vmem:[%s4012_s8 + $0x90] sm:$0xff]  ;;  %v2318_v21 = vld [vmem:[%s4012_s8 + $0x1b8] sm:$0xff] }
 0x28a   : > { %2022 = vmatprep.subr.mxu1 %v1939_v29  ;;  %958 = vmatprep.subr.mxu0 %v949_v35  ;;  %v2334_v29 = vld [vmem:[%s4012_s8 + $0x238] sm:$0xff]  ;;  %v3109_v35 = vpack.c.bf16 %v2280_v27, %v2277_v26  ;;  %v3035_v24 = vpack.c.bf16 %v2321_v22, %v2318_v21  ;;  %v2320_v26 = vld [vmem:[%s4012_s8 + $0x1c8] sm:$0xff]  ;;  %v2359_v22 = vld [vmem:[%s4012_s8 + $0x300] sm:$0xff] }
 0x28b   : > { %v2324_v27 = vld [vmem:[%s4012_s8 + $0x1e8] sm:$0xff] }
 0x28c   : > { %v940_v38 = vpop.permute.xlu0 %939  ;;  %2819 = vmatmul.mubr.msk.f32.vlgmr.msra.gmra.mrb[2].mxu1 %vm788_vm4, %v1931_v36  ;;  %v2101_v41 = vpop.permute.xlu1 %2100 }
 0x28d   : > { %v948_v45 = vsel %vm947_vm10, %v940_v38, %v942_v33  ;;  %2023 = vmatpush1.msra.mxu1 %v1943_v37  ;;  %2086 = vmatprep.mubr.f32.mxu1 %v3276_v0  ;;  %v2284_v33 = vld [vmem:[%s4012_s8 + $0xa8] sm:$0xff]  ;;  %v3111_v37 = vpack.c.bf16 %v2334_v29, %v2331_v28  ;;  %v2283_v38 = vld [vmem:[%s4012_s8 + $0xa0] sm:$0xff] }
 0x28e   : > { %959 = vmatpush1.msra.mxu0 %v948_v45  ;;  %v2340_v45 = vld [vmem:[%s4012_s8 + $0x268] sm:$0xff]  ;;  %v2327_v28 = vld [vmem:[%s4012_s8 + $0x200] sm:$0xff] }
 0x28f   : > { %2807 = vmatmul.mubr.msk.f32.vlgmr.msra.gmra.mrb[4].mxu0 %vm788_vm4, %v938_v42 }
 0x290   : > { %v2103_v46 = vpop.permute.xlu0 %2102  ;;  %2820 = vmatmul.mubr.msk.f32.vlgmr.msra.gmra.mrb[4].mxu1 %vm788_vm4, %v1931_v36  ;;  %v2099_v47 = vpop.permute.xlu1 %2098  ;;  %1093 = vmatprep.mubr.f32.mxu0 %v3276_v0  ;;  %v2291_v36 = vld [vmem:[%s4012_s8 + $0xe0] sm:$0xff] }
 0x291   : > { %v2107_v50 = vsel %vm2106_vm11, %v2099_v47, %v2101_v41  ;;  %v2108_v51 = vsel %vm2106_vm11, %v2101_v41, %v2103_v46  ;;  %2181 = vmatprep.mubr.f32.mxu1 %v3276_v0  ;;  %v2313_v0 = vld [vmem:[%s4012_s8 + $0x190] sm:$0xff]  ;;  %v2286_v41 = vld [vmem:[%s4012_s8 + $0xb8] sm:$0xff] }
 0x292   : > { %2117 = vmatprep.subr.mxu1 %v2108_v51  ;;  %v3099_v5 = vpack.c.bf16 %v2316_v56, %v2313_v0  ;;  %v3113_v51 = vpack.c.bf16 %v2286_v41, %v2283_v38  ;;  %v2343_v0 = vld [vmem:[%s4012_s8 + $0x280] sm:$0xff]  ;;  %v2346_v56 = vld [vmem:[%s4012_s8 + $0x298] sm:$0xff]  ;;  %v2332_v38 = vld [vmem:[%s4012_s8 + $0x228] sm:$0xff] }
 0x293   : > { %2118 = vmatpush1.msra.mxu1 %v2107_v50  ;;  %v2294_v50 = vld [vmem:[%s4012_s8 + $0xf8] sm:$0xff]  ;;  %v3119_v1 = vpack.c.bf16 %v2346_v56, %v2343_v0  ;;  %v2336_v41 = vld [vmem:[%s4012_s8 + $0x248] sm:$0xff]  ;;  %v2351_v56 = vld [vmem:[%s4012_s8 + $0x2c0] sm:$0xff] }
 0x294   : > { %v946_v60 = vpop.permute.xlu0 %945  ;;  %2821 = vmatmul.mubr.msk.f32.vlgmr.msra.gmra.mrb[2].mxu1 %vm788_vm4, %v2097_v48  ;;  %v2105_v61 = vpop.permute.xlu1 %2104  ;;  %v3019_v58 = vpack.c.bf16 %v2297_v52, %v2294_v50  ;;  %v2345_v50 = vld [vmem:[%s4012_s8 + $0x290] sm:$0xff]  ;;  %v2348_v0 = vld [vmem:[%s4012_s8 + $0x2a8] sm:$0xff] }
 0x295   : > { %v950_v3 = vsel %vm947_vm10, %v944_v34, %v946_v60  ;;  %v2109_v4 = vsel %vm2106_vm11, %v2103_v46, %v2105_v61  ;;  %1029 = vmatprep.subr.mxu0 %v946_v60  ;;  %2188 = vmatprep.subr.mxu1 %v2105_v61  ;;  %v2288_v34 = vld [vmem:[%s4012_s8 + $0xc8] sm:$0xff]  ;;  %v3013_v46 = vpack.c.bf16 %v2284_v33, %v2281_v32  ;;  %v2326_v32 = vld [vmem:[%s4012_s8 + $0x1f8] sm:$0xff] }
 0x296   : > { %1030 = vmatpush1.msra.mxu0 %v950_v3  ;;  %2189 = vmatpush1.msra.mxu1 %v2109_v4  ;;  %v3015_v47 = vpack.c.bf16 %v2291_v36, %v2288_v34  ;;  %v2296_v60 = vld [vmem:[%s4012_s8 + $0x108] sm:$0xff]  ;;  %v2298_v3 = vld [vmem:[%s4012_s8 + $0x118] sm:$0xff]  ;;  %v2333_v34 = vld [vmem:[%s4012_s8 + $0x230] sm:$0xff] }
 0x297   : > { %2808 = vmatmul.mubr.msk.f32.vlgmr.msra.gmra.mrb[6].mxu0 %vm788_vm4, %v938_v42  ;;  %2252 = vmatprep.mubr.f32.mxu1 %v3232_v11  ;;  %v2337_v42 = vld [vmem:[%s4012_s8 + $0x250] sm:$0xff]  ;;  %v2300_v61 = vld [vmem:[%s4012_s8 + $0x128] sm:$0xff]  ;;  %v3021_v4 = vpack.c.bf16 %v2296_v60, %v2293_v59  ;;  %v3121_v8 = vpack.c.bf16 %v2298_v3, %v2295_v2  ;;  %v2330_v33 = vld [vmem:[%s4012_s8 + $0x218] sm:$0xff] }
 0x298   : > { %2822 = vmatmul.mubr.msk.f32.vlgmr.msra.gmra.mrb[4].mxu1 %vm788_vm4, %v2097_v48  ;;  %3000 = vmatprep.subr.bf16.mxu0 %v2999_v62  ;;  %v2287_v48 = vld [vmem:[%s4012_s8 + $0xc0] sm:$0xff]  ;;  %v3115_v53 = vpack.c.bf16 %v2340_v45, %v2337_v42  ;;  %v3117_v62 = vpack.c.bf16 %v2292_v55, %v2289_v54  ;;  %v3043_v36 = vpack.c.bf16 %v2333_v34, %v2330_v33  ;;  %v2344_v54 = vld [vmem:[%s4012_s8 + $0x288] sm:$0xff] }
 0x299   : > { %3002 = vmatpush1.bf16.msra.mxu0 %v3001_v63  ;;  %3100 = vmatprep.subr.bf16.mxu1 %v3099_v5  ;;  %v3017_v57 = vpack.c.bf16 %v2290_v49, %v2287_v48  ;;  %v2303_v63 = vld [vmem:[%s4012_s8 + $0x140] sm:$0xff]  ;;  %v2338_v48 = vld [vmem:[%s4012_s8 + $0x258] sm:$0xff]  ;;  %v2352_v59 = vld [vmem:[%s4012_s8 + $0x2c8] sm:$0xff] }
 0x29a   : > { %3004 = vmatprep.subr.bf16.mxu0 %v3003_v6  ;;  %3102 = vmatpush3.bf16.msra.mxu1 %v3101_v10  ;;  %v3023_v5 = vpack.c.bf16 %v2303_v63, %v2300_v61  ;;  %v2299_v6 = vld [vmem:[%s4012_s8 + $0x120] sm:$0xff]  ;;  %v2309_v10 = vld [vmem:[%s4012_s8 + $0x170] sm:$0xff]  ;;  %v2342_v49 = vld [vmem:[%s4012_s8 + $0x278] sm:$0xff] }
 0x29b   : > { %3104 = vmatprep.subr.bf16.mxu1 %v3103_v13  ;;  %v3025_v11 = vpack.c.bf16 %v2302_v7, %v2299_v6  ;;  %v3027_v12 = vpack.c.bf16 %v2309_v10, %v2306_v9  ;;  %v2305_v13 = vld [vmem:[%s4012_s8 + $0x150] sm:$0xff]  ;;  %v2339_v42 = vld [vmem:[%s4012_s8 + $0x260] sm:$0xff]  ;;  %v3051_v52 = vpack.c.bf16 %v2345_v50, %v2342_v49  ;;  %v2350_v61 = vld [vmem:[%s4012_s8 + $0x2b8] sm:$0xff] }
 0x29c   : > { %v3029_v17 = vpack.c.bf16 %v2308_v14, %v2305_v13  ;;  %v2347_v60 = vld [vmem:[%s4012_s8 + $0x2a0] sm:$0xff]  ;;  %v2304_v2 = vld [vmem:[%s4012_s8 + $0x148] sm:$0xff]  ;;  %v2353_v9 = vld [vmem:[%s4012_s8 + $0x2d0] sm:$0xff] }
 0x29d   : > { %3006 = vmatpush1.bf16.msra.mxu0 %v3005_v18  ;;  %v3031_v18 = vpack.c.bf16 %v2315_v16, %v2312_v15  ;;  %v3057_v63 = vpack.c.bf16 %v2350_v61, %v2347_v60  ;;  %v2355_v6 = vld [vmem:[%s4012_s8 + $0x2e0] sm:$0xff]  ;;  %v2356_v10 = vld [vmem:[%s4012_s8 + $0x2e8] sm:$0xff]  ;;  %v2310_v14 = vld [vmem:[%s4012_s8 + $0x178] sm:$0xff] }
 0x29e   : > { %3008 = vmatprep.subr.bf16.mxu0 %v3007_v19  ;;  %3106 = vmatpush3.bf16.msra.mxu1 %v3105_v23  ;;  %v2311_v19 = vld [vmem:[%s4012_s8 + $0x180] sm:$0xff]  ;;  %v2360_v16 = vld [vmem:[%s4012_s8 + $0x308] sm:$0xff]  ;;  %v2377_v61 = vld [vmem:[%s4012_s8 + $0x390] sm:$0xff] }
 0x29f   : > { %3108 = vmatprep.subr.bf16.mxu1 %v3107_v25  ;;  %v3033_v23 = vpack.c.bf16 %v2314_v20, %v2311_v19  ;;  %v2317_v25 = vld [vmem:[%s4012_s8 + $0x1b0] sm:$0xff]  ;;  %v2307_v13 = vld [vmem:[%s4012_s8 + $0x160] sm:$0xff]  ;;  %v3286_v19 = vmov 0.0|0.0  }
 0x2a0   : > { %v3037_v29 = vpack.c.bf16 %v2320_v26, %v2317_v25  ;;  %v3129_v15 = vpack.c.bf16 %v2310_v14, %v2307_v13  ;;  %v2361_v25 = vld [vmem:[%s4012_s8 + $0x310] sm:$0xff]  ;;  %v2364_v26 = vld [vmem:[%s4012_s8 + $0x328] sm:$0xff] }
 0x2a1   : > { %3010 = vmatpush1.bf16.msra.mxu0 %v3009_v30  ;;  %v3039_v30 = vpack.c.bf16 %v2327_v28, %v2324_v27  ;;  %v3132_v34 = vpack.c.bf16 %v2364_v26, %v2361_v25  ;;  %v2393_v13 = vld [vmem:[%s4012_s8 + $0x410] sm:$0xff]  ;;  %v2395_v26 = vld [vmem:[%s4012_s8 + $0x420] sm:$0xff] }
 0x2a2   : > { %3012 = vmatprep.subr.bf16.mxu0 %v3011_v31  ;;  %3110 = vmatpush3.bf16.msra.mxu1 %v3109_v35  ;;  %v2323_v31 = vld [vmem:[%s4012_s8 + $0x1e0] sm:$0xff] }
 0x2a3   : > { %3112 = vmatprep.subr.bf16.mxu1 %v3111_v37  ;;  %v3041_v35 = vpack.c.bf16 %v2326_v32, %v2323_v31  ;;  %v2329_v37 = vld [vmem:[%s4012_s8 + $0x210] sm:$0xff] }
 0x2a4   : > { %v3045_v45 = vpack.c.bf16 %v2332_v38, %v2329_v37  ;;  %v2368_v37 = vld [vmem:[%s4012_s8 + $0x348] sm:$0xff]  ;;  %v2367_v38 = vld [vmem:[%s4012_s8 + $0x340] sm:$0xff] }
 0x2a5   : > { %3014 = vmatpush1.bf16.msra.mxu0 %v3013_v46  ;;  %v3047_v46 = vpack.c.bf16 %v2339_v42, %v2336_v41  ;;  %v2370_v41 = vld [vmem:[%s4012_s8 + $0x358] sm:$0xff] }
 0x2a6   : > { %3016 = vmatprep.subr.bf16.mxu0 %v3015_v47  ;;  %3114 = vmatpush3.bf16.msra.mxu1 %v3113_v51  ;;  %v2335_v47 = vld [vmem:[%s4012_s8 + $0x240] sm:$0xff] }
 0x2a7   : > { %3116 = vmatprep.subr.bf16.mxu1 %v3115_v53  ;;  %v3049_v51 = vpack.c.bf16 %v2338_v48, %v2335_v47  ;;  %v2341_v53 = vld [vmem:[%s4012_s8 + $0x270] sm:$0xff]  ;;  %v2372_v47 = vld [vmem:[%s4012_s8 + $0x368] sm:$0xff]  ;;  %v2375_v48 = vld [vmem:[%s4012_s8 + $0x380] sm:$0xff] }
 0x2a8   : > { %v3053_v55 = vpack.c.bf16 %v2344_v54, %v2341_v53  ;;  %v2371_v53 = vld [vmem:[%s4012_s8 + $0x360] sm:$0xff] }
 0x2a9   : > { %3018 = vmatpush1.bf16.msra.mxu0 %v3017_v57  ;;  %v2349_v57 = vld [vmem:[%s4012_s8 + $0x2b0] sm:$0xff] }
 0x2aa   : > { %3020 = vmatprep.subr.bf16.mxu0 %v3019_v58  ;;  %3118 = vmatpush3.bf16.msra.mxu1 %v3117_v62  ;;  %v3055_v58 = vpack.c.bf16 %v2351_v56, %v2348_v0  ;;  %v3123_v62 = vpack.c.bf16 %v2352_v59, %v2349_v57  ;;  %v2373_v0 = vld [vmem:[%s4012_s8 + $0x370] sm:$0xff]  ;;  %v2376_v56 = vld [vmem:[%s4012_s8 + $0x388] sm:$0xff]  ;;  %v2378_v57 = vld [vmem:[%s4012_s8 + $0x398] sm:$0xff] }
 0x2ab   : > { %3120 = vmatprep.subr.bf16.mxu1 %v3119_v1  ;;  %v2301_v1 = vld [vmem:[%s4012_s8 + $0x130] sm:$0xff]  ;;  %v3138_v60 = vpack.c.bf16 %v2376_v56, %v2373_v0 }
 0x2ac   : > { %v3125_v3 = vpack.c.bf16 %v2304_v2, %v2301_v1  ;;  %v2379_v1 = vld [vmem:[%s4012_s8 + $0x3a0] sm:$0xff]  ;;  %v2382_v2 = vld [vmem:[%s4012_s8 + $0x3b8] sm:$0xff] }
 0x2ad   : > { %3022 = vmatpush1.bf16.msra.mxu0 %v3021_v4  ;;  %v2354_v4 = vld [vmem:[%s4012_s8 + $0x2d8] sm:$0xff] }
 0x2ae   : > { %3024 = vmatprep.subr.bf16.mxu0 %v3023_v5  ;;  %3122 = vmatpush3.bf16.msra.mxu1 %v3121_v8  ;;  %v2357_v5 = vld [vmem:[%s4012_s8 + $0x2f0] sm:$0xff]  ;;  %v2358_v8 = vld [vmem:[%s4012_s8 + $0x2f8] sm:$0xff] }
 0x2af   : > { %3124 = vmatprep.subr.bf16.mxu1 %v3123_v62  ;;  %v3059_v7 = vpack.c.bf16 %v2357_v5, %v2354_v4  ;;  %v2387_v4 = vld [vmem:[%s4012_s8 + $0x3e0] sm:$0xff] }
 0x2b1   : > { %3026 = vmatpush1.bf16.msra.mxu0 %v3025_v11  ;;  %v3127_v11 = vpack.c.bf16 %v2358_v8, %v2355_v6  ;;  %v3141_v6 = vpack.c.bf16 %v2382_v2, %v2379_v1 }
 0x2b2   : > { %3028 = vmatprep.subr.bf16.mxu0 %v3027_v12  ;;  %3126 = vmatpush3.bf16.msra.mxu1 %v3125_v3  ;;  %v3061_v12 = vpack.c.bf16 %v2356_v10, %v2353_v9  ;;  %v2384_v3 = vld [vmem:[%s4012_s8 + $0x3c8] sm:$0xff]  ;;  %v2386_v9 = vld [vmem:[%s4012_s8 + $0x3d8] sm:$0xff]  ;;  %v2385_v10 = vld [vmem:[%s4012_s8 + $0x3d0] sm:$0xff] }
 0x2b3   : > { %3128 = vmatprep.subr.bf16.mxu1 %v3127_v11  ;;  %v3079_v8 = vpack.c.bf16 %v2387_v4, %v2384_v3  ;;  %v2388_v11 = vld [vmem:[%s4012_s8 + $0x3e8] sm:$0xff] }
 0x2b5   : > { %3030 = vmatpush1.bf16.msra.mxu0 %v3029_v17  ;;  %v2363_v17 = vld [vmem:[%s4012_s8 + $0x320] sm:$0xff] }
 0x2b6   : > { %3032 = vmatprep.subr.bf16.mxu0 %v3031_v18  ;;  %3130 = vmatpush3.bf16.msra.mxu1 %v3129_v15  ;;  %v3063_v18 = vpack.c.bf16 %v2363_v17, %v2360_v16  ;;  %v3144_v15 = vpack.c.bf16 %v2388_v11, %v2385_v10  ;;  %v2389_v16 = vld [vmem:[%s4012_s8 + $0x3f0] sm:$0xff] }
 0x2b7   : > { %3131 = vmatprep.subr.bf16.mxu1 %v3286_v19 }
 0x2b9   : > { %3034 = vmatpush1.bf16.msra.mxu0 %v3033_v23 }
 0x2ba   : > { %3036 = vmatprep.subr.bf16.mxu0 %v3035_v24  ;;  %v2362_v24 = vld [vmem:[%s4012_s8 + $0x318] sm:$0xff] }
 0x2bb   : > { %v3065_v33 = vpack.c.bf16 %v2362_v24, %v2359_v22  ;;  %v2396_v22 = vld [vmem:[%s4012_s8 + $0x428] sm:$0xff] }
 0x2bd   : > { %3038 = vmatpush1.bf16.msra.mxu0 %v3037_v29  ;;  %v2366_v29 = vld [vmem:[%s4012_s8 + $0x338] sm:$0xff] }
 0x2be   : > { %3040 = vmatprep.subr.bf16.mxu0 %v3039_v30 }
 0x2c1   : > { %3042 = vmatpush1.bf16.msra.mxu0 %v3041_v35  ;;  %v2365_v35 = vld [vmem:[%s4012_s8 + $0x330] sm:$0xff] }
 0x2c2   : > { %3044 = vmatprep.subr.bf16.mxu0 %v3043_v36 }
 0x2c5   : > { %3046 = vmatpush1.bf16.msra.mxu0 %v3045_v45 }
 0x2c6   : > { %3048 = vmatprep.subr.bf16.mxu0 %v3047_v46 }
 0x2c9   : > { %3050 = vmatpush1.bf16.msra.mxu0 %v3049_v51 }
 0x2ca   : > { %3052 = vmatprep.subr.bf16.mxu0 %v3051_v52  ;;  %v3135_v52 = vpack.c.bf16 %v2370_v41, %v2367_v38  ;;  %v2408_v38 = vld [vmem:[%s4012_s8 + $0x488] sm:$0xff]  ;;  %v2411_v41 = vld [vmem:[%s4012_s8 + $0x4a0] sm:$0xff] }
 0x2cd   : > { %3054 = vmatpush1.bf16.msra.mxu0 %v3053_v55  ;;  %v3071_v55 = vpack.c.bf16 %v2375_v48, %v2372_v47  ;;  %v3095_v47 = vpack.c.bf16 %v2411_v41, %v2408_v38  ;;  %v2410_v48 = vld [vmem:[%s4012_s8 + $0x498] sm:$0xff] }
 0x2ce   : > { %3056 = vmatprep.subr.bf16.mxu0 %v3055_v58  ;;  %v2381_v58 = vld [vmem:[%s4012_s8 + $0x3b0] sm:$0xff] }
 0x2cf   : > { %v3075_v62 = vpack.c.bf16 %v2381_v58, %v2378_v57  ;;  %v2704_v57 = vld [vmem:[%s362_s26] sm:$0xff] }
 0x2d1   : > { %3058 = vmatpush1.bf16.msra.mxu0 %v3057_v63  ;;  %v2380_v63 = vld [vmem:[%s4012_s8 + $0x3a8] sm:$0xff] }
 0x2d2   : > { %3060 = vmatprep.subr.bf16.mxu0 %v3059_v7  ;;  %v3077_v5 = vpack.c.bf16 %v2380_v63, %v2377_v61  ;;  %v2383_v7 = vld [vmem:[%s4012_s8 + $0x3c0] sm:$0xff] }
 0x2d3   : > { %v3081_v14 = vpack.c.bf16 %v2386_v9, %v2383_v7 }
 0x2d5   : > { %3062 = vmatpush1.bf16.msra.mxu0 %v3061_v12  ;;  %v2390_v12 = vld [vmem:[%s4012_s8 + $0x3f8] sm:$0xff] }
 0x2d6   : > { %3064 = vmatprep.subr.bf16.mxu0 %v3063_v18  ;;  %v3083_v17 = vpack.c.bf16 %v2393_v13, %v2390_v12  ;;  %v2392_v18 = vld [vmem:[%s4012_s8 + $0x408] sm:$0xff] }
 0x2d7   : > { %v3085_v24 = vpack.c.bf16 %v2392_v18, %v2389_v16 }
 0x362   : > { %v1024_v20 = vpop.f32.mrb[4].mxu0 }
 0x363   : > { %v1026_v21 = vpop.f32.mrb[5].mxu0  ;;  %v3158_v23 = vadd.f32 %v1024_v20, %v3406_v39  ;;  %v2369_v39 = vld [vmem:[%s4012_s8 + $0x350] sm:$0xff]  ;;  %v2391_v20 = vld [vmem:[%s4012_s8 + $0x400] sm:$0xff] }
 0x364   : > { %v3160_v27 = vadd.f32 %v1026_v21, %v3410_v43  ;;  %v3067_v43 = vpack.c.bf16 %v2369_v39, %v2366_v29  ;;  %v2394_v21 = vld [vmem:[%s4012_s8 + $0x418] sm:$0xff]  ;;  %v2397_v29 = vld [vmem:[%s4012_s8 + $0x430] sm:$0xff]  ;;  %v2400_v39 = vld [vmem:[%s4012_s8 + $0x448] sm:$0xff] }
 0x365   : > { %v3147_v25 = vpack.c.bf16 %v2394_v21, %v2391_v20 }
 0x367   : > { %v2183_v28 = vpop.f32.mrb[2].mxu1 }
 0x368   : > { %v3159_v30 = vadd.f32 %v3158_v23, %v2183_v28  ;;  %v2185_v31 = vpop.f32.mrb[3].mxu1  ;;  %v2399_v23 = vld [vmem:[%s4012_s8 + $0x440] sm:$0xff]  ;;  %v2398_v28 = vld [vmem:[%s4012_s8 + $0x438] sm:$0xff] }
 0x369   : > { %v3161_v32 = vadd.f32 %v3160_v27, %v2185_v31  ;;  %v3087_v27 = vpack.c.bf16 %v2399_v23, %v2396_v22  ;;  %v2405_v31 = vld [vmem:[%s4012_s8 + $0x470] sm:$0xff] }
 0x36a   : > { %v1095_v36 = vpop.f32.mrb[6].mxu0 }
 0x36b   : > { %v3162_v42 = vadd.f32 %v1095_v36, %v3408_v40  ;;  %v1097_v45 = vpop.f32.mrb[7].mxu0  ;;  %v2254_v46 = vpop.f32.mrb[4].mxu1  ;;  %2486 = vmatprep.mubr.f32.mxu0 %v3161_v32  ;;  %2628 = vmatprep.mubr.f32.mxu1 %v3161_v32  ;;  %v3069_v40 = vpack.c.bf16 %v2368_v37, %v2365_v35  ;;  %v3089_v32 = vpack.c.bf16 %v2398_v28, %v2395_v26  ;;  %v2404_v36 = vld [vmem:[%s4012_s8 + $0x468] sm:$0xff]  ;;  %v2406_v37 = vld [vmem:[%s4012_s8 + $0x478] sm:$0xff] }
 0x36c   : > { %v3164_v49 = vadd.f32 %v1097_v45, %v3412_v44  ;;  %v2256_v50 = vpop.f32.mrb[5].mxu1  ;;  %2487 = vmatmul.mubr.f32.vlgmr.msra.gmra.mrb[8].mxu0 %v3159_v30  ;;  %2629 = vmatmul.mubr.f32.vlgmr.msra.gmra.mrb[6].mxu1 %v3159_v30  ;;  %v2374_v44 = vld [vmem:[%s4012_s8 + $0x378] sm:$0xff] }
 0x36d   : > { %v3860_v51 = vadd.f32 %v3162_v42, %v2254_v46  ;;  %3066 = vmatpush1.bf16.msra.mxu0 %v3065_v33  ;;  %3133 = vmatpush1.bf16.msra.mxu1 %v3132_v34  ;;  %v3073_v59 = vpack.c.bf16 %v2374_v44, %v2371_v53  ;;  %v2402_v30 = vld [vmem:[%s4012_s8 + $0x458] sm:$0xff]  ;;  %v3150_v33 = vpack.c.bf16 %v2400_v39, %v2397_v29  ;;  %v2401_v34 = vld [vmem:[%s4012_s8 + $0x450] sm:$0xff]  ;;  %v2407_v46 = vld [vmem:[%s4012_s8 + $0x480] sm:$0xff]  ;;  %v2417_v44 = vpop.permute.xlu0 %2416 }
 0x36e   : > { %v3165_v54 = vadd.f32 %v3164_v49, %v2256_v50  ;;  %3068 = vmatprep.subr.bf16.mxu0 %v3067_v43  ;;  %3134 = vmatprep.subr.bf16.mxu1 %v3286_v19  ;;  %v3091_v35 = vpack.c.bf16 %v2405_v31, %v2402_v30  ;;  %v2403_v43 = vld [vmem:[%s4012_s8 + $0x460] sm:$0xff]  ;;  %v3093_v42 = vpack.c.bf16 %v2404_v36, %v2401_v34  ;;  %v2409_v49 = vld [vmem:[%s4012_s8 + $0x490] sm:$0xff]  ;;  %v2412_v50 = vld [vmem:[%s4012_s8 + $0x4a8] sm:$0xff] }
 0x36f   : > { %v3153_v45 = vpack.c.bf16 %v2406_v37, %v2403_v43 }
 0x370   : > { %2823 = vmatprep.mubr.msk.f32.mxu0 %vm371_vm2, %v3165_v54  ;;  %2824 = vmatprep.mubr.msk.f32.mxu1 %vm371_vm2, %v3165_v54 }
 0x371   : > { %3070 = vmatpush1.bf16.msra.mxu0 %v3069_v40  ;;  %3136 = vmatpush1.bf16.msra.mxu1 %v3135_v52  ;;  %v3097_v40 = vpack.c.bf16 %v2410_v48, %v2407_v46  ;;  %v3156_v52 = vpack.c.bf16 %v2412_v50, %v2409_v49 }
 0x372   : > { %3072 = vmatprep.subr.bf16.mxu0 %v3071_v55  ;;  %3137 = vmatprep.subr.bf16.mxu1 %v3286_v19 }
 0x375   : > { %3074 = vmatpush1.bf16.msra.mxu0 %v3073_v59  ;;  %3139 = vmatpush1.bf16.msra.mxu1 %v3138_v60 }
 0x376   : > { %3076 = vmatprep.subr.bf16.mxu0 %v3075_v62  ;;  %3140 = vmatprep.subr.bf16.mxu1 %v3286_v19  ;;  %v2705_v62 = vld [vmem:[%s362_s26 + $0x8] sm:$0xff] }
 0x379   : > { %3078 = vmatpush1.bf16.msra.mxu0 %v3077_v5  ;;  %3142 = vmatpush1.bf16.msra.mxu1 %v3141_v6 }
 0x37a   : > { %3080 = vmatprep.subr.bf16.mxu0 %v3079_v8  ;;  %3143 = vmatprep.subr.bf16.mxu1 %v3286_v19 }
 0x37d   : > { %3082 = vmatpush1.bf16.msra.mxu0 %v3081_v14  ;;  %3145 = vmatpush1.bf16.msra.mxu1 %v3144_v15 }
 0x37e   : > { %3084 = vmatprep.subr.bf16.mxu0 %v3083_v17  ;;  %3146 = vmatprep.subr.bf16.mxu1 %v3286_v19 }
 0x381   : > { %3086 = vmatpush1.bf16.msra.mxu0 %v3085_v24  ;;  %3148 = vmatpush1.bf16.msra.mxu1 %v3147_v25 }
 0x382   : > { %3088 = vmatprep.subr.bf16.mxu0 %v3087_v27  ;;  %3149 = vmatprep.subr.bf16.mxu1 %v3286_v19 }
 0x385   : > { %3090 = vmatpush1.bf16.msra.mxu0 %v3089_v32  ;;  %3151 = vmatpush1.bf16.msra.mxu1 %v3150_v33 }
 0x386   : > { %3092 = vmatprep.subr.bf16.mxu0 %v3091_v35  ;;  %3152 = vmatprep.subr.bf16.mxu1 %v3286_v19 }
 0x389   : > { %3094 = vmatpush1.bf16.msra.mxu0 %v3093_v42  ;;  %3154 = vmatpush1.bf16.msra.mxu1 %v3153_v45 }
 0x38a   : > { %3096 = vmatprep.subr.bf16.mxu0 %v3095_v47  ;;  %3155 = vmatprep.subr.bf16.mxu1 %v3286_v19  ;;  %v2706_v19 = vld [vmem:[%s362_s26 + $0x10] sm:$0xff] }
 0x38d   : > { %3098 = vmatpush1.bf16.msra.mxu0 %v3097_v40  ;;  %3157 = vmatpush1.bf16.msra.mxu1 %v3156_v52 }
 0x390   : > { %2558 = vmatmul.mubr.f32.vlgmr.msra.gmra.mrb[8].mxu0 %v3860_v51  ;;  %2699 = vmatmul.mubr.f32.vlgmr.msra.gmra.mrb[8].mxu1 %v3860_v51 }
 0x43f   : > { %v2860_v53 = vpop.f32.mrb[6].mxu1 }
 0x440   : > { %v2861_v54 = vpop.f32.mrb[7].mxu1 }
 0x441   : > { %v2862_v55 = vadd.f32 %v2861_v54, %v2860_v53 }
 0x443   : > { %v2631_v0 = vadd.f32 %v2862_v55, %v2417_v44 }
 0x463   : > { %v2559_v56 = vpop.f32.mrb[8].mxu0  ;;  %v2700_v58 = vpop.f32.mrb[8].mxu1 }
 0x464   : > { %v3166_v59 = vadd.f32 %v2559_v56, %v2417_v44  ;;  %v2701_v60 = vadd.f32 %v2700_v58, %v2631_v0  ;;  %v2561_v61 = vpop.f32.mrb[9].mxu0  ;;  %v2702_v63 = vpop.f32.mrb[9].mxu1 }
 0x465   : > { %v3167_v51 = vadd.f32 %v2561_v61, %v2417_v44 }
 0x466   : > { %v2707_v1 = vadd.f32 %v3166_v59, %v2704_v57  ;;  %v2709_v2 = vadd.f32 %v2706_v19, %v2701_v60 }
 0x467   : > { %v2708_v3 = vadd.f32 %v3167_v51, %v2705_v62 }
 0x468   : > { %2710 = vst [vmem:[%s367_s29] sm:$0xff] %v2707_v1  ;;  %2713 = vst.msk [vmem:[%s367_s29 + $0x10] sm:$0xff] %vm2712_vm12, %v2709_v2 }
 0x469   : > { %2711 = vst [vmem:[%s367_s29 + $0x8] sm:$0xff] %v2708_v3 }
 0x46a PF: > { %s20_s30 = sadd.s32 1, %s3271_s30  }
 0x46b   : > { %p17_p3 = scmp.ge.s32.totalorder %s20_s30, 4  }
 0x46d   :  { %19 = sbr.rel (!%p17_p3) target bundleno = 1 (0x1), region = 94 }
 0x474   :  { %2735 = vsyncpa [#allocation4], 1 }
 0x475   :  { %2737 = vsyncpa [#allocation4 + $0x1], 1 }

</bundles_post_ra>
